<compile_context>
chip_gen: v6e
topology: v6e:2x2x1
jax: 0.10.0
libtpu: 0.0.40
codegen_flags: <defaults>
</compile_context>

<pallas_src>
import functools

import jax
import jax.numpy as jnp
from jax import lax
from jax.experimental import pallas as pl
from jax.experimental.pallas import tpu as pltpu


# ---------------------------------------------------------------------------
# Fused two-layer LSTM kernel (time-major inside)
# ---------------------------------------------------------------------------
def _make_encoder_kernel(chunk_len, valid_len, needs_mask):
    """Build the kernel for a fixed seq chunk length (static)."""
    T = chunk_len

    def kernel(
        # inputs
        x_ref,        # (T, Bb, F)   f32   time-major input chunk
        w1_ref,       # (F, 4*H1)    bf16  layer-1 W_ih^T, gates packed (i,f,o,g)
        u1_ref,       # (H1, 4*H1)   bf16  layer-1 W_hh^T
        b1_ref,       # (1, 4*H1)    f32   layer-1 b_ih + b_hh
        w2_ref,       # (H1, 4*H2)   bf16  layer-2 W_ih^T
        u2_ref,       # (H2, 4*H2)   bf16  layer-2 W_hh^T
        b2_ref,       # (1, 4*H2)    f32   layer-2 b_ih + b_hh
        # outputs
        y_ref,        # (T, Bb, H2)  f32   layer-2 hidden states (time-major)
        hn_ref,       # (Bb, H2)     f32   final layer-2 hidden state
        # scratch
        gx1_ref,      # (T, Bb, 4*H1) bf16 hoisted layer-1 input projection
        y1_ref,       # (T, Bb, H1)   f32  layer-1 hidden states (VMEM only)
        gx2_ref,      # (T, Bb, 4*H2) bf16 hoisted layer-2 input projection
        h1_ref, c1_ref,   # (Bb, H1) f32   layer-1 state carried across chunks
        h2_ref, c2_ref,   # (Bb, H2) f32   layer-2 state carried across chunks
    ):
        s = pl.program_id(1)                 # seq-chunk index ("arbitrary")
        _, B, F = x_ref.shape
        H1 = u1_ref.shape[0]
        H2 = u2_ref.shape[0]

        # Unroll: cross-timestep visibility for small batch blocks, but keep it
        # small for large blocks so the recurrence does not become spill-bound.
        if B >= 64:
            unroll = 2 if T % 2 == 0 else 1
        elif T <= 16:
            unroll = T
        elif T % 8 == 0:
            unroll = 8
        elif T % 4 == 0:
            unroll = 4
        else:
            unroll = 1
        unroll = max(1, min(unroll, T))

        @pl.when(s == 0)
        def _init_state():
            h1_ref[...] = jnp.zeros_like(h1_ref)
            c1_ref[...] = jnp.zeros_like(c1_ref)
            h2_ref[...] = jnp.zeros_like(h2_ref)
            c2_ref[...] = jnp.zeros_like(c2_ref)

        # ---- layer-1 input projection: ONE bf16 MXU matmul per chunk.
        x2d = x_ref[...].reshape(T * B, F).astype(jnp.bfloat16)
        gx1 = jnp.dot(x2d, w1_ref[...], preferred_element_type=jnp.float32)
        gx1 = gx1 + b1_ref[...]                      # bias folded in once per chunk
        gx1_ref[...] = gx1.reshape(T, B, 4 * H1).astype(jnp.bfloat16)

        # ---- layer-1 recurrence: only h @ W_hh on the serial critical path.
        u1 = u1_ref[...]

        def step1(t, carry):
            h, c = carry
            gates = jnp.dot(h.astype(jnp.bfloat16), u1,
                            preferred_element_type=jnp.float32)
            gates = gates + gx1_ref[t].astype(jnp.float32)
            sig = jax.nn.sigmoid(gates[:, : 3 * H1])   # contiguous (i, f, o) slab
            i = sig[:, :H1]
            f = sig[:, H1:2 * H1]
            o = sig[:, 2 * H1:]
            g = jnp.tanh(gates[:, 3 * H1:])
            c_new = f * c + i * g
            h_new = o * jnp.tanh(c_new)
            if needs_mask:                              # only traced when padded
                valid = (s * T + t) < valid_len
                c_new = jnp.where(valid, c_new, c)
                h_new = jnp.where(valid, h_new, h)
            y1_ref[t] = h_new
            return h_new, c_new

        h1, c1 = lax.fori_loop(0, T, step1, (h1_ref[...], c1_ref[...]),
                               unroll=unroll)
        h1_ref[...] = h1
        c1_ref[...] = c1

        # ---- layer-2 input projection straight from VMEM-resident y1 (fusion).
        y1_2d = y1_ref[...].reshape(T * B, H1).astype(jnp.bfloat16)
        gx2 = jnp.dot(y1_2d, w2_ref[...], preferred_element_type=jnp.float32)
        gx2 = gx2 + b2_ref[...]
        gx2_ref[...] = gx2.reshape(T, B, 4 * H2).astype(jnp.bfloat16)

        # ---- layer-2 recurrence, writing the output block directly.
        u2 = u2_ref[...]

        def step2(t, carry):
            h, c = carry
            gates = jnp.dot(h.astype(jnp.bfloat16), u2,
                            preferred_element_type=jnp.float32)
            gates = gates + gx2_ref[t].astype(jnp.float32)
            sig = jax.nn.sigmoid(gates[:, : 3 * H2])
            i = sig[:, :H2]
            f = sig[:, H2:2 * H2]
            o = sig[:, 2 * H2:]
            g = jnp.tanh(gates[:, 3 * H2:])
            c_new = f * c + i * g
            h_new = o * jnp.tanh(c_new)
            if needs_mask:
                valid = (s * T + t) < valid_len
                c_new = jnp.where(valid, c_new, c)
                h_new = jnp.where(valid, h_new, h)
            y_ref[t] = h_new
            return h_new, c_new

        h2, c2 = lax.fori_loop(0, T, step2, (h2_ref[...], c2_ref[...]),
                               unroll=unroll)
        h2_ref[...] = h2
        c2_ref[...] = c2

        @pl.when(s == pl.num_programs(1) - 1)
        def _write_hn():
            hn_ref[...] = h2        # h_n only matters after the last chunk

    return kernel


# ---------------------------------------------------------------------------
# Tiling / VMEM budgeting
# ---------------------------------------------------------------------------
def _vmem_capacity_bytes():
    try:
        return int(pltpu.get_tpu_info().vmem_capacity_bytes)
    except Exception:
        return 64 * 1024 * 1024            # conservative (v7x per-TC VMEM)


def _pick_batch_block(bs):
    # (8,128) rule: second-minor block dim must be a multiple of 8 or the full dim.
    if bs % 8 != 0:
        return bs
    # Prefer >=2 blocks of >=64 rows: keeps both v7x TensorCores busy while
    # still filling a good fraction of the MXU per step.
    for cand in (128, 64):
        if bs % cand == 0 and bs // cand >= 2:
            return cand
    blk = min(bs, 128)
    blk -= blk % 8
    while blk >= 8:
        if bs % blk == 0:
            return blk
        blk -= 8
    return bs


def _pick_seq_block(seq_len, block_bs, n_features, H1, H2, budget_bytes):
    # Per-(t, b)-element VMEM bytes:
    #   x in-block f32 x2 (double buffered) + gx1/gx2 bf16 scratch
    #   + y1 f32 scratch + y out-block f32 x2.
    per_elem = 8 * n_features + 8 * H1 + 4 * H1 + 8 * H2 + 8 * H2
    # Chunk-independent residents: bf16 weights (x2 for pipelining), f32 biases,
    # carried h/c state, hn out block.
    w_bytes = 2 * (n_features * 4 * H1 + H1 * 4 * H1 + H1 * 4 * H2 + H2 * 4 * H2)
    fixed = (2 * w_bytes + 8 * (4 * H1 + 4 * H2)
             + 8 * block_bs * (H1 + H2) + 8 * block_bs * H2)
    avail = budget_bytes - fixed
    if avail <= per_elem * block_bs:
        return 1
    t_max = avail // (per_elem * block_bs)
    return int(max(1, min(seq_len, 128, t_max)))


# ---------------------------------------------------------------------------
# Wrapper
# ---------------------------------------------------------------------------
@functools.partial(jax.jit, static_argnames=("block_bs", "seq_block"))
def _encoder_forward(x, p1, p2, block_bs=None, seq_block=None):
    """x: (bs, seq_len, n_features), batch-first like the PyTorch module."""
    bs, seq_len, n_features = x.shape
    H1 = p1["w_hh_t"].shape[0]              # hidden_dim = 2 * embedding_dim
    H2 = p2["w_hh_t"].shape[0]              # embedding_dim

    vmem_cap = _vmem_capacity_bytes()
    vmem_limit = min(int(vmem_cap * 0.75), 96 * 1024 * 1024)
    chunk_budget = int(vmem_limit * 0.8)    # headroom for pipeline buffers

    if block_bs is None:
        block_bs = _pick_batch_block(bs)
    if seq_block is None:
        seq_block = _pick_seq_block(seq_len, block_bs, n_features, H1, H2,
                                    chunk_budget)

    n_seq_blocks = -(-seq_len // seq_block)             # ceil
    seq_pad = n_seq_blocks * seq_block
    grid = (bs // block_bs, n_seq_blocks)

    # Cheap transpose: x is only n_features wide.
    x_tm = jnp.transpose(x, (1, 0, 2))                  # (seq, bs, F)
    if seq_pad != seq_len:
        x_tm = jnp.pad(x_tm, ((0, seq_pad - seq_len), (0, 0), (0, 0)))

    kernel = _make_encoder_kernel(seq_block, seq_len, seq_pad != seq_len)

    full = lambda shape: pl.BlockSpec(shape, lambda b, s: (0, 0))

    y_tm, hn = pl.pallas_call(
        kernel,
        out_shape=(
            jax.ShapeDtypeStruct((seq_pad, bs, H2), jnp.float32),
            jax.ShapeDtypeStruct((bs, H2), jnp.float32),
        ),
        grid_spec=pltpu.PrefetchScalarGridSpec(
            num_scalar_prefetch=0,
            grid=grid,
            in_specs=[
                pl.BlockSpec((seq_block, block_bs, n_features),
                             lambda b, s: (s, b, 0)),
                full((n_features, 4 * H1)),
                full((H1, 4 * H1)),
                full((1, 4 * H1)),
                full((H1, 4 * H2)),
                full((H2, 4 * H2)),
                full((1, 4 * H2)),
            ],
            out_specs=(
                pl.BlockSpec((seq_block, block_bs, H2), lambda b, s: (s, b, 0)),
                pl.BlockSpec((block_bs, H2), lambda b, s: (b, 0)),
            ),
            scratch_shapes=[
                pltpu.VMEM((seq_block, block_bs, 4 * H1), jnp.bfloat16),
                pltpu.VMEM((seq_block, block_bs, H1), jnp.float32),
                pltpu.VMEM((seq_block, block_bs, 4 * H2), jnp.bfloat16),
                pltpu.VMEM((block_bs, H1), jnp.float32),
                pltpu.VMEM((block_bs, H1), jnp.float32),
                pltpu.VMEM((block_bs, H2), jnp.float32),
                pltpu.VMEM((block_bs, H2), jnp.float32),
            ],
        ),
        compiler_params=pltpu.CompilerParams(
            dimension_semantics=("parallel", "arbitrary"),
            vmem_limit_bytes=vmem_limit,
        ),
    )(x_tm, p1["w_ih_t"], p1["w_hh_t"], p1["b"],
      p2["w_ih_t"], p2["w_hh_t"], p2["b"])

    y = jnp.transpose(y_tm[:seq_len], (1, 0, 2))        # back to (bs, seq, E)
    return y, hn


# ---------------------------------------------------------------------------
# Parameters (PyTorch-style init, gate columns repacked (i, f, o, g))
# ---------------------------------------------------------------------------
def _reorder_gates(w):
    """PyTorch packs LSTM gates (i, f, g, o) along the leading 4H axis;
    repack to (i, f, o, g) so one sigmoid covers a contiguous 3H slab."""
    H = w.shape[0] // 4
    i, f, g, o = w[:H], w[H:2 * H], w[2 * H:3 * H], w[3 * H:]
    return jnp.concatenate([i, f, o, g], axis=0)


def init_lstm_params(key, input_size, hidden_size):
    """PyTorch nn.LSTM default init: U(-1/sqrt(H), 1/sqrt(H))."""
    k = 1.0 / float(hidden_size) ** 0.5
    k1, k2, k3, k4 = jax.random.split(key, 4)
    w_ih = jax.random.uniform(k1, (4 * hidden_size, input_size), jnp.float32, -k, k)
    w_hh = jax.random.uniform(k2, (4 * hidden_size, hidden_size), jnp.float32, -k, k)
    b_ih = jax.random.uniform(k3, (4 * hidden_size,), jnp.float32, -k, k)
    b_hh = jax.random.uniform(k4, (4 * hidden_size,), jnp.float32, -k, k)
    return {
        "w_ih_t": _reorder_gates(w_ih).T.astype(jnp.bfloat16),   # (in, 4H) bf16
        "w_hh_t": _reorder_gates(w_hh).T.astype(jnp.bfloat16),   # (H, 4H)  bf16
        "b": _reorder_gates(b_ih + b_hh)[None, :],               # (1, 4H)  f32
    }


class EncoderPallas:
    """Drop-in equivalent of the PyTorch `Encoder` forward pass."""

    def __init__(self, n_features, embedding_dim=64, key=None):
        if key is None:
            key = jax.random.PRNGKey(0)
        self.n_features = n_features
        self.embedding_dim = embedding_dim
        self.hidden_dim = 2 * embedding_dim
        k1, k2 = jax.random.split(key)
        self.p1 = init_lstm_params(k1, n_features, self.hidden_dim)
        self.p2 = init_lstm_params(k2, self.hidden_dim, embedding_dim)

    def __call__(self, x, **tiling):
        return _encoder_forward(x, self.p1, self.p2, **tiling)


# ---------------------------------------------------------------------------
# References for correctness checks
# ---------------------------------------------------------------------------
def _lstm_reference_f32(x_tm, params):
    """Pure-f32 LSTM (weights upcast) — semantic reference."""
    w = params["w_ih_t"].astype(jnp.float32)
    u = params["w_hh_t"].astype(jnp.float32)
    b = params["b"]
    H = u.shape[0]
    B = x_tm.shape[1]

    def step(carry, x_t):
        h, c = carry
        gates = x_t @ w + h @ u + b
        i = jax.nn.sigmoid(gates[:, :H])
        f = jax.nn.sigmoid(gates[:, H:2 * H])
        o = jax.nn.sigmoid(gates[:, 2 * H:3 * H])
        g = jnp.tanh(gates[:, 3 * H:])
        c = f * c + i * g
        h = o * jnp.tanh(c)
        return (h, c), h

    init = (jnp.zeros((B, H), jnp.float32), jnp.zeros((B, H), jnp.float32))
    (h, _), ys = lax.scan(step, init, x_tm)
    return ys, h


def _lstm_reference_mixed(x_tm, params):
    """Mirror of the kernel's bf16-matmul / f32-carry precision."""
    w, u, b = params["w_ih_t"], params["w_hh_t"], params["b"]
    H = u.shape[0]
    B = x_tm.shape[1]
    gx = jnp.einsum("tbf,fg->tbg", x_tm.astype(jnp.bfloat16), w,
                    preferred_element_type=jnp.float32) + b
    gx = gx.astype(jnp.bfloat16)

    def step(carry, gx_t):
        h, c = carry
        gates = jnp.dot(h.astype(jnp.bfloat16), u,
                        preferred_element_type=jnp.float32)
        gates = gates + gx_t.astype(jnp.float32)
        i = jax.nn.sigmoid(gates[:, :H])
        f = jax.nn.sigmoid(gates[:, H:2 * H])
        o = jax.nn.sigmoid(gates[:, 2 * H:3 * H])
        g = jnp.tanh(gates[:, 3 * H:])
        c = f * c + i * g
        h = o * jnp.tanh(c)
        return (h, c), h

    init = (jnp.zeros((B, H), jnp.float32), jnp.zeros((B, H), jnp.float32))
    (h, _), ys = lax.scan(step, init, gx)
    return ys, h


def encoder_reference(x, p1, p2, mixed=False):
    lstm = _lstm_reference_mixed if mixed else _lstm_reference_f32
    x_tm = jnp.transpose(x, (1, 0, 2))
    y1, _ = lstm(x_tm, p1)
    y2, hn = lstm(y1, p2)
    return jnp.transpose(y2, (1, 0, 2)), hn


# ---------------------------------------------------------------------------
# Smoke / correctness test
# ---------------------------------------------------------------------------
if __name__ == "__main__":
    bs, seq_len, n_features, embedding_dim = 2, 8, 4, 32
    key = jax.random.PRNGKey(0)
    kx, kp = jax.random.split(key)
    x = jax.random.normal(kx, (bs, seq_len, n_features), jnp.float32)

    enc = EncoderPallas(n_features, embedding_dim, key=kp)
    y, hn = enc(x)
    jax.block_until_ready((y, hn))

    assert y.shape == (bs, seq_len, embedding_dim)
    assert hn.shape == (bs, embedding_dim)

    # Tight check vs a matched-precision reference, loose check vs pure f32.
    y_mix, hn_mix = encoder_reference(x, enc.p1, enc.p2, mixed=True)
    assert jnp.allclose(y, y_mix, atol=2e-3, rtol=2e-3)
    assert jnp.allclose(hn, hn_mix, atol=2e-3, rtol=2e-3)

    y_f32, hn_f32 = encoder_reference(x, enc.p1, enc.p2, mixed=False)
    assert jnp.allclose(y, y_f32, atol=3e-2, rtol=3e-2)
    assert jnp.allclose(hn, hn_f32, atol=3e-2, rtol=3e-2)

    # Exercise the chunked-sequence + tail-masking path (seq_len=10, chunk=4).
    kx2 = jax.random.PRNGKey(1)
    x2 = jax.random.normal(kx2, (bs, 10, n_features), jnp.float32)
    y2, hn2 = enc(x2, seq_block=4)
    jax.block_until_ready((y2, hn2))
    y2_mix, hn2_mix = encoder_reference(x2, enc.p1, enc.p2, mixed=True)
    assert y2.shape == (bs, 10, embedding_dim)
    assert jnp.allclose(y2, y2_mix, atol=2e-3, rtol=2e-3)
    assert jnp.allclose(hn2, hn2_mix, atol=2e-3, rtol=2e-3)

    print("KERNEL_OK")
</pallas_src>

<mosaic_0001>
module attributes {stable_mosaic.version = 11 : i64} {
  func.func @kernel(%arg0: i32, %arg1: i32, %arg2: memref<8x2x4xf32, #tpu.memory_space<vmem>>, %arg3: memref<4x256xbf16, #tpu.memory_space<vmem>>, %arg4: memref<64x256xbf16, #tpu.memory_space<vmem>>, %arg5: memref<1x256xf32, #tpu.memory_space<vmem>>, %arg6: memref<64x128xbf16, #tpu.memory_space<vmem>>, %arg7: memref<32x128xbf16, #tpu.memory_space<vmem>>, %arg8: memref<1x128xf32, #tpu.memory_space<vmem>>, %arg9: memref<8x2x32xf32, #tpu.memory_space<vmem>>, %arg10: memref<2x32xf32, #tpu.memory_space<vmem>>, %arg11: memref<8x2x256xbf16, #tpu.memory_space<vmem>>, %arg12: memref<8x2x64xf32, #tpu.memory_space<vmem>>, %arg13: memref<8x2x128xbf16, #tpu.memory_space<vmem>>, %arg14: memref<2x64xf32, #tpu.memory_space<vmem>>, %arg15: memref<2x64xf32, #tpu.memory_space<vmem>>, %arg16: memref<2x32xf32, #tpu.memory_space<vmem>>, %arg17: memref<2x32xf32, #tpu.memory_space<vmem>>) attributes {dimension_semantics = [#tpu.dimension_semantics<parallel>, #tpu.dimension_semantics<arbitrary>], iteration_bounds = array<i64: 1, 1>, scalar_prefetch = 0 : i64, scratch_operands = 7 : i64, tpu.core_type = #tpu.core_type<tc>, window_params = [{transform_indices = @transform_0, window_bounds = array<i64: 8, 2, 4>}, {pipeline_mode = #tpu.pipeline_mode<synchronous>, transform_indices = @transform_1, window_bounds = array<i64: 4, 256>}, {pipeline_mode = #tpu.pipeline_mode<synchronous>, transform_indices = @transform_2, window_bounds = array<i64: 64, 256>}, {pipeline_mode = #tpu.pipeline_mode<synchronous>, transform_indices = @transform_3, window_bounds = array<i64: 1, 256>}, {pipeline_mode = #tpu.pipeline_mode<synchronous>, transform_indices = @transform_4, window_bounds = array<i64: 64, 128>}, {pipeline_mode = #tpu.pipeline_mode<synchronous>, transform_indices = @transform_5, window_bounds = array<i64: 32, 128>}, {pipeline_mode = #tpu.pipeline_mode<synchronous>, transform_indices = @transform_6, window_bounds = array<i64: 1, 128>}, {transform_indices = @transform_7, window_bounds = array<i64: 8, 2, 32>}, {transform_indices = @transform_8, window_bounds = array<i64: 2, 32>}]} {
    %c0_i32 = arith.constant 0 : i32
    %0 = arith.cmpi eq, %arg1, %c0_i32 : i32
    %1 = arith.extui %0 : i1 to i32
    %c0_i32_0 = arith.constant 0 : i32
    %2 = arith.cmpi ne, %1, %c0_i32_0 : i32
    scf.if %2 {
      %cst_149 = arith.constant 0.000000e+00 : f32
      %470 = vector.broadcast %cst_149 : f32 to vector<2x64xf32>
      %c0_150 = arith.constant 0 : index
      %c0_151 = arith.constant 0 : index
      %471 = vector.load %arg14[%c0_150, %c0_151] : memref<2x64xf32, #tpu.memory_space<vmem>>, vector<2x64xf32>
      tpu.vector_store %arg14[%c0_150, %c0_151], %470 {strides = array<i32>} : memref<2x64xf32, #tpu.memory_space<vmem>>, vector<2x64xf32>,
      %cst_152 = arith.constant 0.000000e+00 : f32
      %472 = vector.broadcast %cst_152 : f32 to vector<2x64xf32>
      %c0_153 = arith.constant 0 : index
      %c0_154 = arith.constant 0 : index
      %473 = vector.load %arg15[%c0_153, %c0_154] : memref<2x64xf32, #tpu.memory_space<vmem>>, vector<2x64xf32>
      tpu.vector_store %arg15[%c0_153, %c0_154], %472 {strides = array<i32>} : memref<2x64xf32, #tpu.memory_space<vmem>>, vector<2x64xf32>,
      %cst_155 = arith.constant 0.000000e+00 : f32
      %474 = vector.broadcast %cst_155 : f32 to vector<2x32xf32>
      %c0_156 = arith.constant 0 : index
      %c0_157 = arith.constant 0 : index
      %475 = vector.load %arg16[%c0_156, %c0_157] : memref<2x32xf32, #tpu.memory_space<vmem>>, vector<2x32xf32>
      tpu.vector_store %arg16[%c0_156, %c0_157], %474 {strides = array<i32>} : memref<2x32xf32, #tpu.memory_space<vmem>>, vector<2x32xf32>,
      %cst_158 = arith.constant 0.000000e+00 : f32
      %476 = vector.broadcast %cst_158 : f32 to vector<2x32xf32>
      %c0_159 = arith.constant 0 : index
      %c0_160 = arith.constant 0 : index
      %477 = vector.load %arg17[%c0_159, %c0_160] : memref<2x32xf32, #tpu.memory_space<vmem>>, vector<2x32xf32>
      tpu.vector_store %arg17[%c0_159, %c0_160], %476 {strides = array<i32>} : memref<2x32xf32, #tpu.memory_space<vmem>>, vector<2x32xf32>,
    } else {
    }
    %c0 = arith.constant 0 : index
    %c0_1 = arith.constant 0 : index
    %c0_2 = arith.constant 0 : index
    %3 = vector.load %arg2[%c0, %c0_1, %c0_2] : memref<8x2x4xf32, #tpu.memory_space<vmem>>, vector<8x2x4xf32>
    %4 = vector.shape_cast %3 : vector<8x2x4xf32> to vector<16x4xf32>
    %5 = arith.truncf %4 : vector<16x4xf32> to vector<16x4xbf16>
    %c0_3 = arith.constant 0 : index
    %c0_4 = arith.constant 0 : index
    %6 = vector.load %arg3[%c0_3, %c0_4] : memref<4x256xbf16, #tpu.memory_space<vmem>>, vector<4x256xbf16>
    %cst = arith.constant dense<0.000000e+00> : vector<16x256xf32>
    %7 = tpu.matmul %5, %6, %cst {dimension_numbers = #tpu.dot_dimension_numbers<[1], [0], [0], [1], [0, 0, 1, 1], [], []>} : vector<16x4xbf16>, vector<4x256xbf16>, vector<16x256xf32> -> vector<16x256xf32>
    %c0_5 = arith.constant 0 : index
    %c0_6 = arith.constant 0 : index
    %8 = vector.load %arg5[%c0_5, %c0_6] : memref<1x256xf32, #tpu.memory_space<vmem>>, vector<1x256xf32>
    %9 = vector.broadcast %8 : vector<1x256xf32> to vector<16x256xf32>
    %10 = arith.addf %7, %9 : vector<16x256xf32>
    %11 = vector.shape_cast %10 : vector<16x256xf32> to vector<8x2x256xf32>
    %12 = arith.truncf %11 : vector<8x2x256xf32> to vector<8x2x256xbf16>
    %c0_7 = arith.constant 0 : index
    %c0_8 = arith.constant 0 : index
    %c0_9 = arith.constant 0 : index
    %13 = vector.load %arg11[%c0_7, %c0_8, %c0_9] : memref<8x2x256xbf16, #tpu.memory_space<vmem>>, vector<8x2x256xbf16>
    tpu.vector_store %arg11[%c0_7, %c0_8, %c0_9], %12 {strides = array<i32>} : memref<8x2x256xbf16, #tpu.memory_space<vmem>>, vector<8x2x256xbf16>,
    %c0_10 = arith.constant 0 : index
    %c0_11 = arith.constant 0 : index
    %14 = vector.load %arg4[%c0_10, %c0_11] : memref<64x256xbf16, #tpu.memory_space<vmem>>, vector<64x256xbf16>
    %c0_12 = arith.constant 0 : index
    %c0_13 = arith.constant 0 : index
    %15 = vector.load %arg14[%c0_12, %c0_13] : memref<2x64xf32, #tpu.memory_space<vmem>>, vector<2x64xf32>
    %c0_14 = arith.constant 0 : index
    %c0_15 = arith.constant 0 : index
    %16 = vector.load %arg15[%c0_14, %c0_15] : memref<2x64xf32, #tpu.memory_space<vmem>>, vector<2x64xf32>
    %c0_i32_16 = arith.constant 0 : i32
    %17 = arith.truncf %15 : vector<2x64xf32> to vector<2x64xbf16>
    %cst_17 = arith.constant dense<0.000000e+00> : vector<2x256xf32>
    %18 = tpu.matmul %17, %14, %cst_17 {dimension_numbers = #tpu.dot_dimension_numbers<[1], [0], [0], [1], [0, 0, 1, 1], [], []>} : vector<2x64xbf16>, vector<64x256xbf16>, vector<2x256xf32> -> vector<2x256xf32>
    %19 = arith.index_cast %c0_i32_16 : i32 to index
    %c0_18 = arith.constant 0 : index
    %c0_19 = arith.constant 0 : index
    %20 = vector.load %arg11[%19, %c0_18, %c0_19] : memref<8x2x256xbf16, #tpu.memory_space<vmem>>, vector<1x2x256xbf16>
    %21 = vector.shape_cast %20 : vector<1x2x256xbf16> to vector<2x256xbf16>
    %22 = arith.extf %21 : vector<2x256xbf16> to vector<2x256xf32>
    %23 = arith.addf %18, %22 : vector<2x256xf32>
    %24 = vector.extract_strided_slice %23 {offsets = [0, 0], sizes = [2, 192], strides = [1, 1]} : vector<2x256xf32> to vector<2x192xf32>
    %25 = arith.negf %24 : vector<2x192xf32>
    %26 = math.exp %25 : vector<2x192xf32>
    %cst_20 = arith.constant 1.000000e+00 : f32
    %27 = vector.broadcast %cst_20 : f32 to vector<2x192xf32>
    %28 = arith.addf %27, %26 : vector<2x192xf32>
    %29 = arith.divf %27, %28 : vector<2x192xf32>
    %30 = vector.extract_strided_slice %29 {offsets = [0, 0], sizes = [2, 64], strides = [1, 1]} : vector<2x192xf32> to vector<2x64xf32>
    %31 = vector.extract_strided_slice %29 {offsets = [0, 64], sizes = [2, 64], strides = [1, 1]} : vector<2x192xf32> to vector<2x64xf32>
    %32 = vector.extract_strided_slice %29 {offsets = [0, 128], sizes = [2, 64], strides = [1, 1]} : vector<2x192xf32> to vector<2x64xf32>
    %33 = vector.extract_strided_slice %23 {offsets = [0, 192], sizes = [2, 64], strides = [1, 1]} : vector<2x256xf32> to vector<2x64xf32>
    %34 = math.tanh %33 : vector<2x64xf32>
    %35 = arith.mulf %31, %16 : vector<2x64xf32>
    %36 = arith.mulf %30, %34 : vector<2x64xf32>
    %37 = arith.addf %35, %36 : vector<2x64xf32>
    %38 = math.tanh %37 : vector<2x64xf32>
    %39 = arith.mulf %32, %38 : vector<2x64xf32>
    %40 = arith.index_cast %c0_i32_16 : i32 to index
    %c0_21 = arith.constant 0 : index
    %c0_22 = arith.constant 0 : index
    %41 = vector.load %arg12[%40, %c0_21, %c0_22] : memref<8x2x64xf32, #tpu.memory_space<vmem>>, vector<1x2x64xf32>
    %42 = vector.shape_cast %41 : vector<1x2x64xf32> to vector<2x64xf32>
    %43 = vector.shape_cast %39 : vector<2x64xf32> to vector<1x2x64xf32>
    tpu.vector_store %arg12[%40, %c0_21, %c0_22], %43 {strides = array<i32>} : memref<8x2x64xf32, #tpu.memory_space<vmem>>, vector<1x2x64xf32>,
    %c1_i32 = arith.constant 1 : i32
    %44 = arith.truncf %39 : vector<2x64xf32> to vector<2x64xbf16>
    %cst_23 = arith.constant dense<0.000000e+00> : vector<2x256xf32>
    %45 = tpu.matmul %44, %14, %cst_23 {dimension_numbers = #tpu.dot_dimension_numbers<[1], [0], [0], [1], [0, 0, 1, 1], [], []>} : vector<2x64xbf16>, vector<64x256xbf16>, vector<2x256xf32> -> vector<2x256xf32>
    %46 = arith.index_cast %c1_i32 : i32 to index
    %c0_24 = arith.constant 0 : index
    %c0_25 = arith.constant 0 : index
    %47 = vector.load %arg11[%46, %c0_24, %c0_25] : memref<8x2x256xbf16, #tpu.memory_space<vmem>>, vector<1x2x256xbf16>
    %48 = vector.shape_cast %47 : vector<1x2x256xbf16> to vector<2x256xbf16>
    %49 = arith.extf %48 : vector<2x256xbf16> to vector<2x256xf32>
    %50 = arith.addf %45, %49 : vector<2x256xf32>
    %51 = vector.extract_strided_slice %50 {offsets = [0, 0], sizes = [2, 192], strides = [1, 1]} : vector<2x256xf32> to vector<2x192xf32>
    %52 = arith.negf %51 : vector<2x192xf32>
    %53 = math.exp %52 : vector<2x192xf32>
    %cst_26 = arith.constant 1.000000e+00 : f32
    %54 = vector.broadcast %cst_26 : f32 to vector<2x192xf32>
    %55 = arith.addf %54, %53 : vector<2x192xf32>
    %56 = arith.divf %54, %55 : vector<2x192xf32>
    %57 = vector.extract_strided_slice %56 {offsets = [0, 0], sizes = [2, 64], strides = [1, 1]} : vector<2x192xf32> to vector<2x64xf32>
    %58 = vector.extract_strided_slice %56 {offsets = [0, 64], sizes = [2, 64], strides = [1, 1]} : vector<2x192xf32> to vector<2x64xf32>
    %59 = vector.extract_strided_slice %56 {offsets = [0, 128], sizes = [2, 64], strides = [1, 1]} : vector<2x192xf32> to vector<2x64xf32>
    %60 = vector.extract_strided_slice %50 {offsets = [0, 192], sizes = [2, 64], strides = [1, 1]} : vector<2x256xf32> to vector<2x64xf32>
    %61 = math.tanh %60 : vector<2x64xf32>
    %62 = arith.mulf %58, %37 : vector<2x64xf32>
    %63 = arith.mulf %57, %61 : vector<2x64xf32>
    %64 = arith.addf %62, %63 : vector<2x64xf32>
    %65 = math.tanh %64 : vector<2x64xf32>
    %66 = arith.mulf %59, %65 : vector<2x64xf32>
    %67 = arith.index_cast %c1_i32 : i32 to index
    %c0_27 = arith.constant 0 : index
    %c0_28 = arith.constant 0 : index
    %68 = vector.load %arg12[%67, %c0_27, %c0_28] : memref<8x2x64xf32, #tpu.memory_space<vmem>>, vector<1x2x64xf32>
    %69 = vector.shape_cast %68 : vector<1x2x64xf32> to vector<2x64xf32>
    %70 = vector.shape_cast %66 : vector<2x64xf32> to vector<1x2x64xf32>
    tpu.vector_store %arg12[%67, %c0_27, %c0_28], %70 {strides = array<i32>} : memref<8x2x64xf32, #tpu.memory_space<vmem>>, vector<1x2x64xf32>,
    %c2_i32 = arith.constant 2 : i32
    %71 = arith.truncf %66 : vector<2x64xf32> to vector<2x64xbf16>
    %cst_29 = arith.constant dense<0.000000e+00> : vector<2x256xf32>
    %72 = tpu.matmul %71, %14, %cst_29 {dimension_numbers = #tpu.dot_dimension_numbers<[1], [0], [0], [1], [0, 0, 1, 1], [], []>} : vector<2x64xbf16>, vector<64x256xbf16>, vector<2x256xf32> -> vector<2x256xf32>
    %73 = arith.index_cast %c2_i32 : i32 to index
    %c0_30 = arith.constant 0 : index
    %c0_31 = arith.constant 0 : index
    %74 = vector.load %arg11[%73, %c0_30, %c0_31] : memref<8x2x256xbf16, #tpu.memory_space<vmem>>, vector<1x2x256xbf16>
    %75 = vector.shape_cast %74 : vector<1x2x256xbf16> to vector<2x256xbf16>
    %76 = arith.extf %75 : vector<2x256xbf16> to vector<2x256xf32>
    %77 = arith.addf %72, %76 : vector<2x256xf32>
    %78 = vector.extract_strided_slice %77 {offsets = [0, 0], sizes = [2, 192], strides = [1, 1]} : vector<2x256xf32> to vector<2x192xf32>
    %79 = arith.negf %78 : vector<2x192xf32>
    %80 = math.exp %79 : vector<2x192xf32>
    %cst_32 = arith.constant 1.000000e+00 : f32
    %81 = vector.broadcast %cst_32 : f32 to vector<2x192xf32>
    %82 = arith.addf %81, %80 : vector<2x192xf32>
    %83 = arith.divf %81, %82 : vector<2x192xf32>
    %84 = vector.extract_strided_slice %83 {offsets = [0, 0], sizes = [2, 64], strides = [1, 1]} : vector<2x192xf32> to vector<2x64xf32>
    %85 = vector.extract_strided_slice %83 {offsets = [0, 64], sizes = [2, 64], strides = [1, 1]} : vector<2x192xf32> to vector<2x64xf32>
    %86 = vector.extract_strided_slice %83 {offsets = [0, 128], sizes = [2, 64], strides = [1, 1]} : vector<2x192xf32> to vector<2x64xf32>
    %87 = vector.extract_strided_slice %77 {offsets = [0, 192], sizes = [2, 64], strides = [1, 1]} : vector<2x256xf32> to vector<2x64xf32>
    %88 = math.tanh %87 : vector<2x64xf32>
    %89 = arith.mulf %85, %64 : vector<2x64xf32>
    %90 = arith.mulf %84, %88 : vector<2x64xf32>
    %91 = arith.addf %89, %90 : vector<2x64xf32>
    %92 = math.tanh %91 : vector<2x64xf32>
    %93 = arith.mulf %86, %92 : vector<2x64xf32>
    %94 = arith.index_cast %c2_i32 : i32 to index
    %c0_33 = arith.constant 0 : index
    %c0_34 = arith.constant 0 : index
    %95 = vector.load %arg12[%94, %c0_33, %c0_34] : memref<8x2x64xf32, #tpu.memory_space<vmem>>, vector<1x2x64xf32>
    %96 = vector.shape_cast %95 : vector<1x2x64xf32> to vector<2x64xf32>
    %97 = vector.shape_cast %93 : vector<2x64xf32> to vector<1x2x64xf32>
    tpu.vector_store %arg12[%94, %c0_33, %c0_34], %97 {strides = array<i32>} : memref<8x2x64xf32, #tpu.memory_space<vmem>>, vector<1x2x64xf32>,
    %c3_i32 = arith.constant 3 : i32
    %98 = arith.truncf %93 : vector<2x64xf32> to vector<2x64xbf16>
    %cst_35 = arith.constant dense<0.000000e+00> : vector<2x256xf32>
    %99 = tpu.matmul %98, %14, %cst_35 {dimension_numbers = #tpu.dot_dimension_numbers<[1], [0], [0], [1], [0, 0, 1, 1], [], []>} : vector<2x64xbf16>, vector<64x256xbf16>, vector<2x256xf32> -> vector<2x256xf32>
    %100 = arith.index_cast %c3_i32 : i32 to index
    %c0_36 = arith.constant 0 : index
    %c0_37 = arith.constant 0 : index
    %101 = vector.load %arg11[%100, %c0_36, %c0_37] : memref<8x2x256xbf16, #tpu.memory_space<vmem>>, vector<1x2x256xbf16>
    %102 = vector.shape_cast %101 : vector<1x2x256xbf16> to vector<2x256xbf16>
    %103 = arith.extf %102 : vector<2x256xbf16> to vector<2x256xf32>
    %104 = arith.addf %99, %103 : vector<2x256xf32>
    %105 = vector.extract_strided_slice %104 {offsets = [0, 0], sizes = [2, 192], strides = [1, 1]} : vector<2x256xf32> to vector<2x192xf32>
    %106 = arith.negf %105 : vector<2x192xf32>
    %107 = math.exp %106 : vector<2x192xf32>
    %cst_38 = arith.constant 1.000000e+00 : f32
    %108 = vector.broadcast %cst_38 : f32 to vector<2x192xf32>
    %109 = arith.addf %108, %107 : vector<2x192xf32>
    %110 = arith.divf %108, %109 : vector<2x192xf32>
    %111 = vector.extract_strided_slice %110 {offsets = [0, 0], sizes = [2, 64], strides = [1, 1]} : vector<2x192xf32> to vector<2x64xf32>
    %112 = vector.extract_strided_slice %110 {offsets = [0, 64], sizes = [2, 64], strides = [1, 1]} : vector<2x192xf32> to vector<2x64xf32>
    %113 = vector.extract_strided_slice %110 {offsets = [0, 128], sizes = [2, 64], strides = [1, 1]} : vector<2x192xf32> to vector<2x64xf32>
    %114 = vector.extract_strided_slice %104 {offsets = [0, 192], sizes = [2, 64], strides = [1, 1]} : vector<2x256xf32> to vector<2x64xf32>
    %115 = math.tanh %114 : vector<2x64xf32>
    %116 = arith.mulf %112, %91 : vector<2x64xf32>
    %117 = arith.mulf %111, %115 : vector<2x64xf32>
    %118 = arith.addf %116, %117 : vector<2x64xf32>
    %119 = math.tanh %118 : vector<2x64xf32>
    %120 = arith.mulf %113, %119 : vector<2x64xf32>
    %121 = arith.index_cast %c3_i32 : i32 to index
    %c0_39 = arith.constant 0 : index
    %c0_40 = arith.constant 0 : index
    %122 = vector.load %arg12[%121, %c0_39, %c0_40] : memref<8x2x64xf32, #tpu.memory_space<vmem>>, vector<1x2x64xf32>
    %123 = vector.shape_cast %122 : vector<1x2x64xf32> to vector<2x64xf32>
    %124 = vector.shape_cast %120 : vector<2x64xf32> to vector<1x2x64xf32>
    tpu.vector_store %arg12[%121, %c0_39, %c0_40], %124 {strides = array<i32>} : memref<8x2x64xf32, #tpu.memory_space<vmem>>, vector<1x2x64xf32>,
    %c4_i32 = arith.constant 4 : i32
    %125 = arith.truncf %120 : vector<2x64xf32> to vector<2x64xbf16>
    %cst_41 = arith.constant dense<0.000000e+00> : vector<2x256xf32>
    %126 = tpu.matmul %125, %14, %cst_41 {dimension_numbers = #tpu.dot_dimension_numbers<[1], [0], [0], [1], [0, 0, 1, 1], [], []>} : vector<2x64xbf16>, vector<64x256xbf16>, vector<2x256xf32> -> vector<2x256xf32>
    %127 = arith.index_cast %c4_i32 : i32 to index
    %c0_42 = arith.constant 0 : index
    %c0_43 = arith.constant 0 : index
    %128 = vector.load %arg11[%127, %c0_42, %c0_43] : memref<8x2x256xbf16, #tpu.memory_space<vmem>>, vector<1x2x256xbf16>
    %129 = vector.shape_cast %128 : vector<1x2x256xbf16> to vector<2x256xbf16>
    %130 = arith.extf %129 : vector<2x256xbf16> to vector<2x256xf32>
    %131 = arith.addf %126, %130 : vector<2x256xf32>
    %132 = vector.extract_strided_slice %131 {offsets = [0, 0], sizes = [2, 192], strides = [1, 1]} : vector<2x256xf32> to vector<2x192xf32>
    %133 = arith.negf %132 : vector<2x192xf32>
    %134 = math.exp %133 : vector<2x192xf32>
    %cst_44 = arith.constant 1.000000e+00 : f32
    %135 = vector.broadcast %cst_44 : f32 to vector<2x192xf32>
    %136 = arith.addf %135, %134 : vector<2x192xf32>
    %137 = arith.divf %135, %136 : vector<2x192xf32>
    %138 = vector.extract_strided_slice %137 {offsets = [0, 0], sizes = [2, 64], strides = [1, 1]} : vector<2x192xf32> to vector<2x64xf32>
    %139 = vector.extract_strided_slice %137 {offsets = [0, 64], sizes = [2, 64], strides = [1, 1]} : vector<2x192xf32> to vector<2x64xf32>
    %140 = vector.extract_strided_slice %137 {offsets = [0, 128], sizes = [2, 64], strides = [1, 1]} : vector<2x192xf32> to vector<2x64xf32>
    %141 = vector.extract_strided_slice %131 {offsets = [0, 192], sizes = [2, 64], strides = [1, 1]} : vector<2x256xf32> to vector<2x64xf32>
    %142 = math.tanh %141 : vector<2x64xf32>
    %143 = arith.mulf %139, %118 : vector<2x64xf32>
    %144 = arith.mulf %138, %142 : vector<2x64xf32>
    %145 = arith.addf %143, %144 : vector<2x64xf32>
    %146 = math.tanh %145 : vector<2x64xf32>
    %147 = arith.mulf %140, %146 : vector<2x64xf32>
    %148 = arith.index_cast %c4_i32 : i32 to index
    %c0_45 = arith.constant 0 : index
    %c0_46 = arith.constant 0 : index
    %149 = vector.load %arg12[%148, %c0_45, %c0_46] : memref<8x2x64xf32, #tpu.memory_space<vmem>>, vector<1x2x64xf32>
    %150 = vector.shape_cast %149 : vector<1x2x64xf32> to vector<2x64xf32>
    %151 = vector.shape_cast %147 : vector<2x64xf32> to vector<1x2x64xf32>
    tpu.vector_store %arg12[%148, %c0_45, %c0_46], %151 {strides = array<i32>} : memref<8x2x64xf32, #tpu.memory_space<vmem>>, vector<1x2x64xf32>,
    %c5_i32 = arith.constant 5 : i32
    %152 = arith.truncf %147 : vector<2x64xf32> to vector<2x64xbf16>
    %cst_47 = arith.constant dense<0.000000e+00> : vector<2x256xf32>
    %153 = tpu.matmul %152, %14, %cst_47 {dimension_numbers = #tpu.dot_dimension_numbers<[1], [0], [0], [1], [0, 0, 1, 1], [], []>} : vector<2x64xbf16>, vector<64x256xbf16>, vector<2x256xf32> -> vector<2x256xf32>
    %154 = arith.index_cast %c5_i32 : i32 to index
    %c0_48 = arith.constant 0 : index
    %c0_49 = arith.constant 0 : index
    %155 = vector.load %arg11[%154, %c0_48, %c0_49] : memref<8x2x256xbf16, #tpu.memory_space<vmem>>, vector<1x2x256xbf16>
    %156 = vector.shape_cast %155 : vector<1x2x256xbf16> to vector<2x256xbf16>
    %157 = arith.extf %156 : vector<2x256xbf16> to vector<2x256xf32>
    %158 = arith.addf %153, %157 : vector<2x256xf32>
    %159 = vector.extract_strided_slice %158 {offsets = [0, 0], sizes = [2, 192], strides = [1, 1]} : vector<2x256xf32> to vector<2x192xf32>
    %160 = arith.negf %159 : vector<2x192xf32>
    %161 = math.exp %160 : vector<2x192xf32>
    %cst_50 = arith.constant 1.000000e+00 : f32
    %162 = vector.broadcast %cst_50 : f32 to vector<2x192xf32>
    %163 = arith.addf %162, %161 : vector<2x192xf32>
    %164 = arith.divf %162, %163 : vector<2x192xf32>
    %165 = vector.extract_strided_slice %164 {offsets = [0, 0], sizes = [2, 64], strides = [1, 1]} : vector<2x192xf32> to vector<2x64xf32>
    %166 = vector.extract_strided_slice %164 {offsets = [0, 64], sizes = [2, 64], strides = [1, 1]} : vector<2x192xf32> to vector<2x64xf32>
    %167 = vector.extract_strided_slice %164 {offsets = [0, 128], sizes = [2, 64], strides = [1, 1]} : vector<2x192xf32> to vector<2x64xf32>
    %168 = vector.extract_strided_slice %158 {offsets = [0, 192], sizes = [2, 64], strides = [1, 1]} : vector<2x256xf32> to vector<2x64xf32>
    %169 = math.tanh %168 : vector<2x64xf32>
    %170 = arith.mulf %166, %145 : vector<2x64xf32>
    %171 = arith.mulf %165, %169 : vector<2x64xf32>
    %172 = arith.addf %170, %171 : vector<2x64xf32>
    %173 = math.tanh %172 : vector<2x64xf32>
    %174 = arith.mulf %167, %173 : vector<2x64xf32>
    %175 = arith.index_cast %c5_i32 : i32 to index
    %c0_51 = arith.constant 0 : index
    %c0_52 = arith.constant 0 : index
    %176 = vector.load %arg12[%175, %c0_51, %c0_52] : memref<8x2x64xf32, #tpu.memory_space<vmem>>, vector<1x2x64xf32>
    %177 = vector.shape_cast %176 : vector<1x2x64xf32> to vector<2x64xf32>
    %178 = vector.shape_cast %174 : vector<2x64xf32> to vector<1x2x64xf32>
    tpu.vector_store %arg12[%175, %c0_51, %c0_52], %178 {strides = array<i32>} : memref<8x2x64xf32, #tpu.memory_space<vmem>>, vector<1x2x64xf32>,
    %c6_i32 = arith.constant 6 : i32
    %179 = arith.truncf %174 : vector<2x64xf32> to vector<2x64xbf16>
    %cst_53 = arith.constant dense<0.000000e+00> : vector<2x256xf32>
    %180 = tpu.matmul %179, %14, %cst_53 {dimension_numbers = #tpu.dot_dimension_numbers<[1], [0], [0], [1], [0, 0, 1, 1], [], []>} : vector<2x64xbf16>, vector<64x256xbf16>, vector<2x256xf32> -> vector<2x256xf32>
    %181 = arith.index_cast %c6_i32 : i32 to index
    %c0_54 = arith.constant 0 : index
    %c0_55 = arith.constant 0 : index
    %182 = vector.load %arg11[%181, %c0_54, %c0_55] : memref<8x2x256xbf16, #tpu.memory_space<vmem>>, vector<1x2x256xbf16>
    %183 = vector.shape_cast %182 : vector<1x2x256xbf16> to vector<2x256xbf16>
    %184 = arith.extf %183 : vector<2x256xbf16> to vector<2x256xf32>
    %185 = arith.addf %180, %184 : vector<2x256xf32>
    %186 = vector.extract_strided_slice %185 {offsets = [0, 0], sizes = [2, 192], strides = [1, 1]} : vector<2x256xf32> to vector<2x192xf32>
    %187 = arith.negf %186 : vector<2x192xf32>
    %188 = math.exp %187 : vector<2x192xf32>
    %cst_56 = arith.constant 1.000000e+00 : f32
    %189 = vector.broadcast %cst_56 : f32 to vector<2x192xf32>
    %190 = arith.addf %189, %188 : vector<2x192xf32>
    %191 = arith.divf %189, %190 : vector<2x192xf32>
    %192 = vector.extract_strided_slice %191 {offsets = [0, 0], sizes = [2, 64], strides = [1, 1]} : vector<2x192xf32> to vector<2x64xf32>
    %193 = vector.extract_strided_slice %191 {offsets = [0, 64], sizes = [2, 64], strides = [1, 1]} : vector<2x192xf32> to vector<2x64xf32>
    %194 = vector.extract_strided_slice %191 {offsets = [0, 128], sizes = [2, 64], strides = [1, 1]} : vector<2x192xf32> to vector<2x64xf32>
    %195 = vector.extract_strided_slice %185 {offsets = [0, 192], sizes = [2, 64], strides = [1, 1]} : vector<2x256xf32> to vector<2x64xf32>
    %196 = math.tanh %195 : vector<2x64xf32>
    %197 = arith.mulf %193, %172 : vector<2x64xf32>
    %198 = arith.mulf %192, %196 : vector<2x64xf32>
    %199 = arith.addf %197, %198 : vector<2x64xf32>
    %200 = math.tanh %199 : vector<2x64xf32>
    %201 = arith.mulf %194, %200 : vector<2x64xf32>
    %202 = arith.index_cast %c6_i32 : i32 to index
    %c0_57 = arith.constant 0 : index
    %c0_58 = arith.constant 0 : index
    %203 = vector.load %arg12[%202, %c0_57, %c0_58] : memref<8x2x64xf32, #tpu.memory_space<vmem>>, vector<1x2x64xf32>
    %204 = vector.shape_cast %203 : vector<1x2x64xf32> to vector<2x64xf32>
    %205 = vector.shape_cast %201 : vector<2x64xf32> to vector<1x2x64xf32>
    tpu.vector_store %arg12[%202, %c0_57, %c0_58], %205 {strides = array<i32>} : memref<8x2x64xf32, #tpu.memory_space<vmem>>, vector<1x2x64xf32>,
    %c7_i32 = arith.constant 7 : i32
    %206 = arith.truncf %201 : vector<2x64xf32> to vector<2x64xbf16>
    %cst_59 = arith.constant dense<0.000000e+00> : vector<2x256xf32>
    %207 = tpu.matmul %206, %14, %cst_59 {dimension_numbers = #tpu.dot_dimension_numbers<[1], [0], [0], [1], [0, 0, 1, 1], [], []>} : vector<2x64xbf16>, vector<64x256xbf16>, vector<2x256xf32> -> vector<2x256xf32>
    %208 = arith.index_cast %c7_i32 : i32 to index
    %c0_60 = arith.constant 0 : index
    %c0_61 = arith.constant 0 : index
    %209 = vector.load %arg11[%208, %c0_60, %c0_61] : memref<8x2x256xbf16, #tpu.memory_space<vmem>>, vector<1x2x256xbf16>
    %210 = vector.shape_cast %209 : vector<1x2x256xbf16> to vector<2x256xbf16>
    %211 = arith.extf %210 : vector<2x256xbf16> to vector<2x256xf32>
    %212 = arith.addf %207, %211 : vector<2x256xf32>
    %213 = vector.extract_strided_slice %212 {offsets = [0, 0], sizes = [2, 192], strides = [1, 1]} : vector<2x256xf32> to vector<2x192xf32>
    %214 = arith.negf %213 : vector<2x192xf32>
    %215 = math.exp %214 : vector<2x192xf32>
    %cst_62 = arith.constant 1.000000e+00 : f32
    %216 = vector.broadcast %cst_62 : f32 to vector<2x192xf32>
    %217 = arith.addf %216, %215 : vector<2x192xf32>
    %218 = arith.divf %216, %217 : vector<2x192xf32>
    %219 = vector.extract_strided_slice %218 {offsets = [0, 0], sizes = [2, 64], strides = [1, 1]} : vector<2x192xf32> to vector<2x64xf32>
    %220 = vector.extract_strided_slice %218 {offsets = [0, 64], sizes = [2, 64], strides = [1, 1]} : vector<2x192xf32> to vector<2x64xf32>
    %221 = vector.extract_strided_slice %218 {offsets = [0, 128], sizes = [2, 64], strides = [1, 1]} : vector<2x192xf32> to vector<2x64xf32>
    %222 = vector.extract_strided_slice %212 {offsets = [0, 192], sizes = [2, 64], strides = [1, 1]} : vector<2x256xf32> to vector<2x64xf32>
    %223 = math.tanh %222 : vector<2x64xf32>
    %224 = arith.mulf %220, %199 : vector<2x64xf32>
    %225 = arith.mulf %219, %223 : vector<2x64xf32>
    %226 = arith.addf %224, %225 : vector<2x64xf32>
    %227 = math.tanh %226 : vector<2x64xf32>
    %228 = arith.mulf %221, %227 : vector<2x64xf32>
    %229 = arith.index_cast %c7_i32 : i32 to index
    %c0_63 = arith.constant 0 : index
    %c0_64 = arith.constant 0 : index
    %230 = vector.load %arg12[%229, %c0_63, %c0_64] : memref<8x2x64xf32, #tpu.memory_space<vmem>>, vector<1x2x64xf32>
    %231 = vector.shape_cast %230 : vector<1x2x64xf32> to vector<2x64xf32>
    %232 = vector.shape_cast %228 : vector<2x64xf32> to vector<1x2x64xf32>
    tpu.vector_store %arg12[%229, %c0_63, %c0_64], %232 {strides = array<i32>} : memref<8x2x64xf32, #tpu.memory_space<vmem>>, vector<1x2x64xf32>,
    %c8_i32 = arith.constant 8 : i32
    %c0_65 = arith.constant 0 : index
    %c0_66 = arith.constant 0 : index
    %233 = vector.load %arg14[%c0_65, %c0_66] : memref<2x64xf32, #tpu.memory_space<vmem>>, vector<2x64xf32>
    tpu.vector_store %arg14[%c0_65, %c0_66], %228 {strides = array<i32>} : memref<2x64xf32, #tpu.memory_space<vmem>>, vector<2x64xf32>,
    %c0_67 = arith.constant 0 : index
    %c0_68 = arith.constant 0 : index
    %234 = vector.load %arg15[%c0_67, %c0_68] : memref<2x64xf32, #tpu.memory_space<vmem>>, vector<2x64xf32>
    tpu.vector_store %arg15[%c0_67, %c0_68], %226 {strides = array<i32>} : memref<2x64xf32, #tpu.memory_space<vmem>>, vector<2x64xf32>,
    %c0_69 = arith.constant 0 : index
    %c0_70 = arith.constant 0 : index
    %c0_71 = arith.constant 0 : index
    %235 = vector.load %arg12[%c0_69, %c0_70, %c0_71] : memref<8x2x64xf32, #tpu.memory_space<vmem>>, vector<8x2x64xf32>
    %236 = vector.shape_cast %235 : vector<8x2x64xf32> to vector<16x64xf32>
    %237 = arith.truncf %236 : vector<16x64xf32> to vector<16x64xbf16>
    %c0_72 = arith.constant 0 : index
    %c0_73 = arith.constant 0 : index
    %238 = vector.load %arg6[%c0_72, %c0_73] : memref<64x128xbf16, #tpu.memory_space<vmem>>, vector<64x128xbf16>
    %cst_74 = arith.constant dense<0.000000e+00> : vector<16x128xf32>
    %239 = tpu.matmul %237, %238, %cst_74 {dimension_numbers = #tpu.dot_dimension_numbers<[1], [0], [0], [1], [0, 0, 1, 1], [], []>} : vector<16x64xbf16>, vector<64x128xbf16>, vector<16x128xf32> -> vector<16x128xf32>
    %c0_75 = arith.constant 0 : index
    %c0_76 = arith.constant 0 : index
    %240 = vector.load %arg8[%c0_75, %c0_76] : memref<1x128xf32, #tpu.memory_space<vmem>>, vector<1x128xf32>
    %241 = vector.broadcast %240 : vector<1x128xf32> to vector<16x128xf32>
    %242 = arith.addf %239, %241 : vector<16x128xf32>
    %243 = vector.shape_cast %242 : vector<16x128xf32> to vector<8x2x128xf32>
    %244 = arith.truncf %243 : vector<8x2x128xf32> to vector<8x2x128xbf16>
    %c0_77 = arith.constant 0 : index
    %c0_78 = arith.constant 0 : index
    %c0_79 = arith.constant 0 : index
    %245 = vector.load %arg13[%c0_77, %c0_78, %c0_79] : memref<8x2x128xbf16, #tpu.memory_space<vmem>>, vector<8x2x128xbf16>
    tpu.vector_store %arg13[%c0_77, %c0_78, %c0_79], %244 {strides = array<i32>} : memref<8x2x128xbf16, #tpu.memory_space<vmem>>, vector<8x2x128xbf16>,
    %c0_80 = arith.constant 0 : index
    %c0_81 = arith.constant 0 : index
    %246 = vector.load %arg7[%c0_80, %c0_81] : memref<32x128xbf16, #tpu.memory_space<vmem>>, vector<32x128xbf16>
    %c0_82 = arith.constant 0 : index
    %c0_83 = arith.constant 0 : index
    %247 = vector.load %arg16[%c0_82, %c0_83] : memref<2x32xf32, #tpu.memory_space<vmem>>, vector<2x32xf32>
    %c0_84 = arith.constant 0 : index
    %c0_85 = arith.constant 0 : index
    %248 = vector.load %arg17[%c0_84, %c0_85] : memref<2x32xf32, #tpu.memory_space<vmem>>, vector<2x32xf32>
    %c0_i32_86 = arith.constant 0 : i32
    %249 = arith.truncf %247 : vector<2x32xf32> to vector<2x32xbf16>
    %cst_87 = arith.constant dense<0.000000e+00> : vector<2x128xf32>
    %250 = tpu.matmul %249, %246, %cst_87 {dimension_numbers = #tpu.dot_dimension_numbers<[1], [0], [0], [1], [0, 0, 1, 1], [], []>} : vector<2x32xbf16>, vector<32x128xbf16>, vector<2x128xf32> -> vector<2x128xf32>
    %251 = arith.index_cast %c0_i32_86 : i32 to index
    %c0_88 = arith.constant 0 : index
    %c0_89 = arith.constant 0 : index
    %252 = vector.load %arg13[%251, %c0_88, %c0_89] : memref<8x2x128xbf16, #tpu.memory_space<vmem>>, vector<1x2x128xbf16>
    %253 = vector.shape_cast %252 : vector<1x2x128xbf16> to vector<2x128xbf16>
    %254 = arith.extf %253 : vector<2x128xbf16> to vector<2x128xf32>
    %255 = arith.addf %250, %254 : vector<2x128xf32>
    %256 = vector.extract_strided_slice %255 {offsets = [0, 0], sizes = [2, 96], strides = [1, 1]} : vector<2x128xf32> to vector<2x96xf32>
    %257 = arith.negf %256 : vector<2x96xf32>
    %258 = math.exp %257 : vector<2x96xf32>
    %cst_90 = arith.constant 1.000000e+00 : f32
    %259 = vector.broadcast %cst_90 : f32 to vector<2x96xf32>
    %260 = arith.addf %259, %258 : vector<2x96xf32>
    %261 = arith.divf %259, %260 : vector<2x96xf32>
    %262 = vector.extract_strided_slice %261 {offsets = [0, 0], sizes = [2, 32], strides = [1, 1]} : vector<2x96xf32> to vector<2x32xf32>
    %263 = vector.extract_strided_slice %261 {offsets = [0, 32], sizes = [2, 32], strides = [1, 1]} : vector<2x96xf32> to vector<2x32xf32>
    %264 = vector.extract_strided_slice %261 {offsets = [0, 64], sizes = [2, 32], strides = [1, 1]} : vector<2x96xf32> to vector<2x32xf32>
    %265 = vector.extract_strided_slice %255 {offsets = [0, 96], sizes = [2, 32], strides = [1, 1]} : vector<2x128xf32> to vector<2x32xf32>
    %266 = math.tanh %265 : vector<2x32xf32>
    %267 = arith.mulf %263, %248 : vector<2x32xf32>
    %268 = arith.mulf %262, %266 : vector<2x32xf32>
    %269 = arith.addf %267, %268 : vector<2x32xf32>
    %270 = math.tanh %269 : vector<2x32xf32>
    %271 = arith.mulf %264, %270 : vector<2x32xf32>
    %272 = arith.index_cast %c0_i32_86 : i32 to index
    %c0_91 = arith.constant 0 : index
    %c0_92 = arith.constant 0 : index
    %273 = vector.load %arg9[%272, %c0_91, %c0_92] : memref<8x2x32xf32, #tpu.memory_space<vmem>>, vector<1x2x32xf32>
    %274 = vector.shape_cast %273 : vector<1x2x32xf32> to vector<2x32xf32>
    %275 = vector.shape_cast %271 : vector<2x32xf32> to vector<1x2x32xf32>
    tpu.vector_store %arg9[%272, %c0_91, %c0_92], %275 {strides = array<i32>} : memref<8x2x32xf32, #tpu.memory_space<vmem>>, vector<1x2x32xf32>,
    %c1_i32_93 = arith.constant 1 : i32
    %276 = arith.truncf %271 : vector<2x32xf32> to vector<2x32xbf16>
    %cst_94 = arith.constant dense<0.000000e+00> : vector<2x128xf32>
    %277 = tpu.matmul %276, %246, %cst_94 {dimension_numbers = #tpu.dot_dimension_numbers<[1], [0], [0], [1], [0, 0, 1, 1], [], []>} : vector<2x32xbf16>, vector<32x128xbf16>, vector<2x128xf32> -> vector<2x128xf32>
    %278 = arith.index_cast %c1_i32_93 : i32 to index
    %c0_95 = arith.constant 0 : index
    %c0_96 = arith.constant 0 : index
    %279 = vector.load %arg13[%278, %c0_95, %c0_96] : memref<8x2x128xbf16, #tpu.memory_space<vmem>>, vector<1x2x128xbf16>
    %280 = vector.shape_cast %279 : vector<1x2x128xbf16> to vector<2x128xbf16>
    %281 = arith.extf %280 : vector<2x128xbf16> to vector<2x128xf32>
    %282 = arith.addf %277, %281 : vector<2x128xf32>
    %283 = vector.extract_strided_slice %282 {offsets = [0, 0], sizes = [2, 96], strides = [1, 1]} : vector<2x128xf32> to vector<2x96xf32>
    %284 = arith.negf %283 : vector<2x96xf32>
    %285 = math.exp %284 : vector<2x96xf32>
    %cst_97 = arith.constant 1.000000e+00 : f32
    %286 = vector.broadcast %cst_97 : f32 to vector<2x96xf32>
    %287 = arith.addf %286, %285 : vector<2x96xf32>
    %288 = arith.divf %286, %287 : vector<2x96xf32>
    %289 = vector.extract_strided_slice %288 {offsets = [0, 0], sizes = [2, 32], strides = [1, 1]} : vector<2x96xf32> to vector<2x32xf32>
    %290 = vector.extract_strided_slice %288 {offsets = [0, 32], sizes = [2, 32], strides = [1, 1]} : vector<2x96xf32> to vector<2x32xf32>
    %291 = vector.extract_strided_slice %288 {offsets = [0, 64], sizes = [2, 32], strides = [1, 1]} : vector<2x96xf32> to vector<2x32xf32>
    %292 = vector.extract_strided_slice %282 {offsets = [0, 96], sizes = [2, 32], strides = [1, 1]} : vector<2x128xf32> to vector<2x32xf32>
    %293 = math.tanh %292 : vector<2x32xf32>
    %294 = arith.mulf %290, %269 : vector<2x32xf32>
    %295 = arith.mulf %289, %293 : vector<2x32xf32>
    %296 = arith.addf %294, %295 : vector<2x32xf32>
    %297 = math.tanh %296 : vector<2x32xf32>
    %298 = arith.mulf %291, %297 : vector<2x32xf32>
    %299 = arith.index_cast %c1_i32_93 : i32 to index
    %c0_98 = arith.constant 0 : index
    %c0_99 = arith.constant 0 : index
    %300 = vector.load %arg9[%299, %c0_98, %c0_99] : memref<8x2x32xf32, #tpu.memory_space<vmem>>, vector<1x2x32xf32>
    %301 = vector.shape_cast %300 : vector<1x2x32xf32> to vector<2x32xf32>
    %302 = vector.shape_cast %298 : vector<2x32xf32> to vector<1x2x32xf32>
    tpu.vector_store %arg9[%299, %c0_98, %c0_99], %302 {strides = array<i32>} : memref<8x2x32xf32, #tpu.memory_space<vmem>>, vector<1x2x32xf32>,
    %c2_i32_100 = arith.constant 2 : i32
    %303 = arith.truncf %298 : vector<2x32xf32> to vector<2x32xbf16>
    %cst_101 = arith.constant dense<0.000000e+00> : vector<2x128xf32>
    %304 = tpu.matmul %303, %246, %cst_101 {dimension_numbers = #tpu.dot_dimension_numbers<[1], [0], [0], [1], [0, 0, 1, 1], [], []>} : vector<2x32xbf16>, vector<32x128xbf16>, vector<2x128xf32> -> vector<2x128xf32>
    %305 = arith.index_cast %c2_i32_100 : i32 to index
    %c0_102 = arith.constant 0 : index
    %c0_103 = arith.constant 0 : index
    %306 = vector.load %arg13[%305, %c0_102, %c0_103] : memref<8x2x128xbf16, #tpu.memory_space<vmem>>, vector<1x2x128xbf16>
    %307 = vector.shape_cast %306 : vector<1x2x128xbf16> to vector<2x128xbf16>
    %308 = arith.extf %307 : vector<2x128xbf16> to vector<2x128xf32>
    %309 = arith.addf %304, %308 : vector<2x128xf32>
    %310 = vector.extract_strided_slice %309 {offsets = [0, 0], sizes = [2, 96], strides = [1, 1]} : vector<2x128xf32> to vector<2x96xf32>
    %311 = arith.negf %310 : vector<2x96xf32>
    %312 = math.exp %311 : vector<2x96xf32>
    %cst_104 = arith.constant 1.000000e+00 : f32
    %313 = vector.broadcast %cst_104 : f32 to vector<2x96xf32>
    %314 = arith.addf %313, %312 : vector<2x96xf32>
    %315 = arith.divf %313, %314 : vector<2x96xf32>
    %316 = vector.extract_strided_slice %315 {offsets = [0, 0], sizes = [2, 32], strides = [1, 1]} : vector<2x96xf32> to vector<2x32xf32>
    %317 = vector.extract_strided_slice %315 {offsets = [0, 32], sizes = [2, 32], strides = [1, 1]} : vector<2x96xf32> to vector<2x32xf32>
    %318 = vector.extract_strided_slice %315 {offsets = [0, 64], sizes = [2, 32], strides = [1, 1]} : vector<2x96xf32> to vector<2x32xf32>
    %319 = vector.extract_strided_slice %309 {offsets = [0, 96], sizes = [2, 32], strides = [1, 1]} : vector<2x128xf32> to vector<2x32xf32>
    %320 = math.tanh %319 : vector<2x32xf32>
    %321 = arith.mulf %317, %296 : vector<2x32xf32>
    %322 = arith.mulf %316, %320 : vector<2x32xf32>
    %323 = arith.addf %321, %322 : vector<2x32xf32>
    %324 = math.tanh %323 : vector<2x32xf32>
    %325 = arith.mulf %318, %324 : vector<2x32xf32>
    %326 = arith.index_cast %c2_i32_100 : i32 to index
    %c0_105 = arith.constant 0 : index
    %c0_106 = arith.constant 0 : index
    %327 = vector.load %arg9[%326, %c0_105, %c0_106] : memref<8x2x32xf32, #tpu.memory_space<vmem>>, vector<1x2x32xf32>
    %328 = vector.shape_cast %327 : vector<1x2x32xf32> to vector<2x32xf32>
    %329 = vector.shape_cast %325 : vector<2x32xf32> to vector<1x2x32xf32>
    tpu.vector_store %arg9[%326, %c0_105, %c0_106], %329 {strides = array<i32>} : memref<8x2x32xf32, #tpu.memory_space<vmem>>, vector<1x2x32xf32>,
    %c3_i32_107 = arith.constant 3 : i32
    %330 = arith.truncf %325 : vector<2x32xf32> to vector<2x32xbf16>
    %cst_108 = arith.constant dense<0.000000e+00> : vector<2x128xf32>
    %331 = tpu.matmul %330, %246, %cst_108 {dimension_numbers = #tpu.dot_dimension_numbers<[1], [0], [0], [1], [0, 0, 1, 1], [], []>} : vector<2x32xbf16>, vector<32x128xbf16>, vector<2x128xf32> -> vector<2x128xf32>
    %332 = arith.index_cast %c3_i32_107 : i32 to index
    %c0_109 = arith.constant 0 : index
    %c0_110 = arith.constant 0 : index
    %333 = vector.load %arg13[%332, %c0_109, %c0_110] : memref<8x2x128xbf16, #tpu.memory_space<vmem>>, vector<1x2x128xbf16>
    %334 = vector.shape_cast %333 : vector<1x2x128xbf16> to vector<2x128xbf16>
    %335 = arith.extf %334 : vector<2x128xbf16> to vector<2x128xf32>
    %336 = arith.addf %331, %335 : vector<2x128xf32>
    %337 = vector.extract_strided_slice %336 {offsets = [0, 0], sizes = [2, 96], strides = [1, 1]} : vector<2x128xf32> to vector<2x96xf32>
    %338 = arith.negf %337 : vector<2x96xf32>
    %339 = math.exp %338 : vector<2x96xf32>
    %cst_111 = arith.constant 1.000000e+00 : f32
    %340 = vector.broadcast %cst_111 : f32 to vector<2x96xf32>
    %341 = arith.addf %340, %339 : vector<2x96xf32>
    %342 = arith.divf %340, %341 : vector<2x96xf32>
    %343 = vector.extract_strided_slice %342 {offsets = [0, 0], sizes = [2, 32], strides = [1, 1]} : vector<2x96xf32> to vector<2x32xf32>
    %344 = vector.extract_strided_slice %342 {offsets = [0, 32], sizes = [2, 32], strides = [1, 1]} : vector<2x96xf32> to vector<2x32xf32>
    %345 = vector.extract_strided_slice %342 {offsets = [0, 64], sizes = [2, 32], strides = [1, 1]} : vector<2x96xf32> to vector<2x32xf32>
    %346 = vector.extract_strided_slice %336 {offsets = [0, 96], sizes = [2, 32], strides = [1, 1]} : vector<2x128xf32> to vector<2x32xf32>
    %347 = math.tanh %346 : vector<2x32xf32>
    %348 = arith.mulf %344, %323 : vector<2x32xf32>
    %349 = arith.mulf %343, %347 : vector<2x32xf32>
    %350 = arith.addf %348, %349 : vector<2x32xf32>
    %351 = math.tanh %350 : vector<2x32xf32>
    %352 = arith.mulf %345, %351 : vector<2x32xf32>
    %353 = arith.index_cast %c3_i32_107 : i32 to index
    %c0_112 = arith.constant 0 : index
    %c0_113 = arith.constant 0 : index
    %354 = vector.load %arg9[%353, %c0_112, %c0_113] : memref<8x2x32xf32, #tpu.memory_space<vmem>>, vector<1x2x32xf32>
    %355 = vector.shape_cast %354 : vector<1x2x32xf32> to vector<2x32xf32>
    %356 = vector.shape_cast %352 : vector<2x32xf32> to vector<1x2x32xf32>
    tpu.vector_store %arg9[%353, %c0_112, %c0_113], %356 {strides = array<i32>} : memref<8x2x32xf32, #tpu.memory_space<vmem>>, vector<1x2x32xf32>,
    %c4_i32_114 = arith.constant 4 : i32
    %357 = arith.truncf %352 : vector<2x32xf32> to vector<2x32xbf16>
    %cst_115 = arith.constant dense<0.000000e+00> : vector<2x128xf32>
    %358 = tpu.matmul %357, %246, %cst_115 {dimension_numbers = #tpu.dot_dimension_numbers<[1], [0], [0], [1], [0, 0, 1, 1], [], []>} : vector<2x32xbf16>, vector<32x128xbf16>, vector<2x128xf32> -> vector<2x128xf32>
    %359 = arith.index_cast %c4_i32_114 : i32 to index
    %c0_116 = arith.constant 0 : index
    %c0_117 = arith.constant 0 : index
    %360 = vector.load %arg13[%359, %c0_116, %c0_117] : memref<8x2x128xbf16, #tpu.memory_space<vmem>>, vector<1x2x128xbf16>
    %361 = vector.shape_cast %360 : vector<1x2x128xbf16> to vector<2x128xbf16>
    %362 = arith.extf %361 : vector<2x128xbf16> to vector<2x128xf32>
    %363 = arith.addf %358, %362 : vector<2x128xf32>
    %364 = vector.extract_strided_slice %363 {offsets = [0, 0], sizes = [2, 96], strides = [1, 1]} : vector<2x128xf32> to vector<2x96xf32>
    %365 = arith.negf %364 : vector<2x96xf32>
    %366 = math.exp %365 : vector<2x96xf32>
    %cst_118 = arith.constant 1.000000e+00 : f32
    %367 = vector.broadcast %cst_118 : f32 to vector<2x96xf32>
    %368 = arith.addf %367, %366 : vector<2x96xf32>
    %369 = arith.divf %367, %368 : vector<2x96xf32>
    %370 = vector.extract_strided_slice %369 {offsets = [0, 0], sizes = [2, 32], strides = [1, 1]} : vector<2x96xf32> to vector<2x32xf32>
    %371 = vector.extract_strided_slice %369 {offsets = [0, 32], sizes = [2, 32], strides = [1, 1]} : vector<2x96xf32> to vector<2x32xf32>
    %372 = vector.extract_strided_slice %369 {offsets = [0, 64], sizes = [2, 32], strides = [1, 1]} : vector<2x96xf32> to vector<2x32xf32>
    %373 = vector.extract_strided_slice %363 {offsets = [0, 96], sizes = [2, 32], strides = [1, 1]} : vector<2x128xf32> to vector<2x32xf32>
    %374 = math.tanh %373 : vector<2x32xf32>
    %375 = arith.mulf %371, %350 : vector<2x32xf32>
    %376 = arith.mulf %370, %374 : vector<2x32xf32>
    %377 = arith.addf %375, %376 : vector<2x32xf32>
    %378 = math.tanh %377 : vector<2x32xf32>
    %379 = arith.mulf %372, %378 : vector<2x32xf32>
    %380 = arith.index_cast %c4_i32_114 : i32 to index
    %c0_119 = arith.constant 0 : index
    %c0_120 = arith.constant 0 : index
    %381 = vector.load %arg9[%380, %c0_119, %c0_120] : memref<8x2x32xf32, #tpu.memory_space<vmem>>, vector<1x2x32xf32>
    %382 = vector.shape_cast %381 : vector<1x2x32xf32> to vector<2x32xf32>
    %383 = vector.shape_cast %379 : vector<2x32xf32> to vector<1x2x32xf32>
    tpu.vector_store %arg9[%380, %c0_119, %c0_120], %383 {strides = array<i32>} : memref<8x2x32xf32, #tpu.memory_space<vmem>>, vector<1x2x32xf32>,
    %c5_i32_121 = arith.constant 5 : i32
    %384 = arith.truncf %379 : vector<2x32xf32> to vector<2x32xbf16>
    %cst_122 = arith.constant dense<0.000000e+00> : vector<2x128xf32>
    %385 = tpu.matmul %384, %246, %cst_122 {dimension_numbers = #tpu.dot_dimension_numbers<[1], [0], [0], [1], [0, 0, 1, 1], [], []>} : vector<2x32xbf16>, vector<32x128xbf16>, vector<2x128xf32> -> vector<2x128xf32>
    %386 = arith.index_cast %c5_i32_121 : i32 to index
    %c0_123 = arith.constant 0 : index
    %c0_124 = arith.constant 0 : index
    %387 = vector.load %arg13[%386, %c0_123, %c0_124] : memref<8x2x128xbf16, #tpu.memory_space<vmem>>, vector<1x2x128xbf16>
    %388 = vector.shape_cast %387 : vector<1x2x128xbf16> to vector<2x128xbf16>
    %389 = arith.extf %388 : vector<2x128xbf16> to vector<2x128xf32>
    %390 = arith.addf %385, %389 : vector<2x128xf32>
    %391 = vector.extract_strided_slice %390 {offsets = [0, 0], sizes = [2, 96], strides = [1, 1]} : vector<2x128xf32> to vector<2x96xf32>
    %392 = arith.negf %391 : vector<2x96xf32>
    %393 = math.exp %392 : vector<2x96xf32>
    %cst_125 = arith.constant 1.000000e+00 : f32
    %394 = vector.broadcast %cst_125 : f32 to vector<2x96xf32>
    %395 = arith.addf %394, %393 : vector<2x96xf32>
    %396 = arith.divf %394, %395 : vector<2x96xf32>
    %397 = vector.extract_strided_slice %396 {offsets = [0, 0], sizes = [2, 32], strides = [1, 1]} : vector<2x96xf32> to vector<2x32xf32>
    %398 = vector.extract_strided_slice %396 {offsets = [0, 32], sizes = [2, 32], strides = [1, 1]} : vector<2x96xf32> to vector<2x32xf32>
    %399 = vector.extract_strided_slice %396 {offsets = [0, 64], sizes = [2, 32], strides = [1, 1]} : vector<2x96xf32> to vector<2x32xf32>
    %400 = vector.extract_strided_slice %390 {offsets = [0, 96], sizes = [2, 32], strides = [1, 1]} : vector<2x128xf32> to vector<2x32xf32>
    %401 = math.tanh %400 : vector<2x32xf32>
    %402 = arith.mulf %398, %377 : vector<2x32xf32>
    %403 = arith.mulf %397, %401 : vector<2x32xf32>
    %404 = arith.addf %402, %403 : vector<2x32xf32>
    %405 = math.tanh %404 : vector<2x32xf32>
    %406 = arith.mulf %399, %405 : vector<2x32xf32>
    %407 = arith.index_cast %c5_i32_121 : i32 to index
    %c0_126 = arith.constant 0 : index
    %c0_127 = arith.constant 0 : index
    %408 = vector.load %arg9[%407, %c0_126, %c0_127] : memref<8x2x32xf32, #tpu.memory_space<vmem>>, vector<1x2x32xf32>
    %409 = vector.shape_cast %408 : vector<1x2x32xf32> to vector<2x32xf32>
    %410 = vector.shape_cast %406 : vector<2x32xf32> to vector<1x2x32xf32>
    tpu.vector_store %arg9[%407, %c0_126, %c0_127], %410 {strides = array<i32>} : memref<8x2x32xf32, #tpu.memory_space<vmem>>, vector<1x2x32xf32>,
    %c6_i32_128 = arith.constant 6 : i32
    %411 = arith.truncf %406 : vector<2x32xf32> to vector<2x32xbf16>
    %cst_129 = arith.constant dense<0.000000e+00> : vector<2x128xf32>
    %412 = tpu.matmul %411, %246, %cst_129 {dimension_numbers = #tpu.dot_dimension_numbers<[1], [0], [0], [1], [0, 0, 1, 1], [], []>} : vector<2x32xbf16>, vector<32x128xbf16>, vector<2x128xf32> -> vector<2x128xf32>
    %413 = arith.index_cast %c6_i32_128 : i32 to index
    %c0_130 = arith.constant 0 : index
    %c0_131 = arith.constant 0 : index
    %414 = vector.load %arg13[%413, %c0_130, %c0_131] : memref<8x2x128xbf16, #tpu.memory_space<vmem>>, vector<1x2x128xbf16>
    %415 = vector.shape_cast %414 : vector<1x2x128xbf16> to vector<2x128xbf16>
    %416 = arith.extf %415 : vector<2x128xbf16> to vector<2x128xf32>
    %417 = arith.addf %412, %416 : vector<2x128xf32>
    %418 = vector.extract_strided_slice %417 {offsets = [0, 0], sizes = [2, 96], strides = [1, 1]} : vector<2x128xf32> to vector<2x96xf32>
    %419 = arith.negf %418 : vector<2x96xf32>
    %420 = math.exp %419 : vector<2x96xf32>
    %cst_132 = arith.constant 1.000000e+00 : f32
    %421 = vector.broadcast %cst_132 : f32 to vector<2x96xf32>
    %422 = arith.addf %421, %420 : vector<2x96xf32>
    %423 = arith.divf %421, %422 : vector<2x96xf32>
    %424 = vector.extract_strided_slice %423 {offsets = [0, 0], sizes = [2, 32], strides = [1, 1]} : vector<2x96xf32> to vector<2x32xf32>
    %425 = vector.extract_strided_slice %423 {offsets = [0, 32], sizes = [2, 32], strides = [1, 1]} : vector<2x96xf32> to vector<2x32xf32>
    %426 = vector.extract_strided_slice %423 {offsets = [0, 64], sizes = [2, 32], strides = [1, 1]} : vector<2x96xf32> to vector<2x32xf32>
    %427 = vector.extract_strided_slice %417 {offsets = [0, 96], sizes = [2, 32], strides = [1, 1]} : vector<2x128xf32> to vector<2x32xf32>
    %428 = math.tanh %427 : vector<2x32xf32>
    %429 = arith.mulf %425, %404 : vector<2x32xf32>
    %430 = arith.mulf %424, %428 : vector<2x32xf32>
    %431 = arith.addf %429, %430 : vector<2x32xf32>
    %432 = math.tanh %431 : vector<2x32xf32>
    %433 = arith.mulf %426, %432 : vector<2x32xf32>
    %434 = arith.index_cast %c6_i32_128 : i32 to index
    %c0_133 = arith.constant 0 : index
    %c0_134 = arith.constant 0 : index
    %435 = vector.load %arg9[%434, %c0_133, %c0_134] : memref<8x2x32xf32, #tpu.memory_space<vmem>>, vector<1x2x32xf32>
    %436 = vector.shape_cast %435 : vector<1x2x32xf32> to vector<2x32xf32>
    %437 = vector.shape_cast %433 : vector<2x32xf32> to vector<1x2x32xf32>
    tpu.vector_store %arg9[%434, %c0_133, %c0_134], %437 {strides = array<i32>} : memref<8x2x32xf32, #tpu.memory_space<vmem>>, vector<1x2x32xf32>,
    %c7_i32_135 = arith.constant 7 : i32
    %438 = arith.truncf %433 : vector<2x32xf32> to vector<2x32xbf16>
    %cst_136 = arith.constant dense<0.000000e+00> : vector<2x128xf32>
    %439 = tpu.matmul %438, %246, %cst_136 {dimension_numbers = #tpu.dot_dimension_numbers<[1], [0], [0], [1], [0, 0, 1, 1], [], []>} : vector<2x32xbf16>, vector<32x128xbf16>, vector<2x128xf32> -> vector<2x128xf32>
    %440 = arith.index_cast %c7_i32_135 : i32 to index
    %c0_137 = arith.constant 0 : index
    %c0_138 = arith.constant 0 : index
    %441 = vector.load %arg13[%440, %c0_137, %c0_138] : memref<8x2x128xbf16, #tpu.memory_space<vmem>>, vector<1x2x128xbf16>
    %442 = vector.shape_cast %441 : vector<1x2x128xbf16> to vector<2x128xbf16>
    %443 = arith.extf %442 : vector<2x128xbf16> to vector<2x128xf32>
    %444 = arith.addf %439, %443 : vector<2x128xf32>
    %445 = vector.extract_strided_slice %444 {offsets = [0, 0], sizes = [2, 96], strides = [1, 1]} : vector<2x128xf32> to vector<2x96xf32>
    %446 = arith.negf %445 : vector<2x96xf32>
    %447 = math.exp %446 : vector<2x96xf32>
    %cst_139 = arith.constant 1.000000e+00 : f32
    %448 = vector.broadcast %cst_139 : f32 to vector<2x96xf32>
    %449 = arith.addf %448, %447 : vector<2x96xf32>
    %450 = arith.divf %448, %449 : vector<2x96xf32>
    %451 = vector.extract_strided_slice %450 {offsets = [0, 0], sizes = [2, 32], strides = [1, 1]} : vector<2x96xf32> to vector<2x32xf32>
    %452 = vector.extract_strided_slice %450 {offsets = [0, 32], sizes = [2, 32], strides = [1, 1]} : vector<2x96xf32> to vector<2x32xf32>
    %453 = vector.extract_strided_slice %450 {offsets = [0, 64], sizes = [2, 32], strides = [1, 1]} : vector<2x96xf32> to vector<2x32xf32>
    %454 = vector.extract_strided_slice %444 {offsets = [0, 96], sizes = [2, 32], strides = [1, 1]} : vector<2x128xf32> to vector<2x32xf32>
    %455 = math.tanh %454 : vector<2x32xf32>
    %456 = arith.mulf %452, %431 : vector<2x32xf32>
    %457 = arith.mulf %451, %455 : vector<2x32xf32>
    %458 = arith.addf %456, %457 : vector<2x32xf32>
    %459 = math.tanh %458 : vector<2x32xf32>
    %460 = arith.mulf %453, %459 : vector<2x32xf32>
    %461 = arith.index_cast %c7_i32_135 : i32 to index
    %c0_140 = arith.constant 0 : index
    %c0_141 = arith.constant 0 : index
    %462 = vector.load %arg9[%461, %c0_140, %c0_141] : memref<8x2x32xf32, #tpu.memory_space<vmem>>, vector<1x2x32xf32>
    %463 = vector.shape_cast %462 : vector<1x2x32xf32> to vector<2x32xf32>
    %464 = vector.shape_cast %460 : vector<2x32xf32> to vector<1x2x32xf32>
    tpu.vector_store %arg9[%461, %c0_140, %c0_141], %464 {strides = array<i32>} : memref<8x2x32xf32, #tpu.memory_space<vmem>>, vector<1x2x32xf32>,
    %c8_i32_142 = arith.constant 8 : i32
    %c0_143 = arith.constant 0 : index
    %c0_144 = arith.constant 0 : index
    %465 = vector.load %arg16[%c0_143, %c0_144] : memref<2x32xf32, #tpu.memory_space<vmem>>, vector<2x32xf32>
    tpu.vector_store %arg16[%c0_143, %c0_144], %460 {strides = array<i32>} : memref<2x32xf32, #tpu.memory_space<vmem>>, vector<2x32xf32>,
    %c0_145 = arith.constant 0 : index
    %c0_146 = arith.constant 0 : index
    %466 = vector.load %arg17[%c0_145, %c0_146] : memref<2x32xf32, #tpu.memory_space<vmem>>, vector<2x32xf32>
    tpu.vector_store %arg17[%c0_145, %c0_146], %458 {strides = array<i32>} : memref<2x32xf32, #tpu.memory_space<vmem>>, vector<2x32xf32>,
    %c0_i32_147 = arith.constant 0 : i32
    %467 = arith.cmpi eq, %arg1, %c0_i32_147 : i32
    %468 = arith.extui %467 : i1 to i32
    %c0_i32_148 = arith.constant 0 : i32
    %469 = arith.cmpi ne, %468, %c0_i32_148 : i32
    scf.if %469 {
      %c0_149 = arith.constant 0 : index
      %c0_150 = arith.constant 0 : index
      %470 = vector.load %arg10[%c0_149, %c0_150] : memref<2x32xf32, #tpu.memory_space<vmem>>, vector<2x32xf32>
      tpu.vector_store %arg10[%c0_149, %c0_150], %460 {strides = array<i32>} : memref<2x32xf32, #tpu.memory_space<vmem>>, vector<2x32xf32>,
    } else {
    }
    return
  }
  func.func @transform_0(%arg0: i32, %arg1: i32) -> (i32, i32, i32) {
    %c0_i32 = arith.constant 0 : i32
    %c0_i32_0 = arith.constant 0 : i32
    return %arg1, %arg0, %c0_i32 : i32, i32, i32
  }
  func.func @transform_1(%arg0: i32, %arg1: i32) -> (i32, i32) {
    %c0_i32 = arith.constant 0 : i32
    %c0_i32_0 = arith.constant 0 : i32
    %c0_i32_1 = arith.constant 0 : i32
    return %c0_i32, %c0_i32_0 : i32, i32
  }
  func.func @transform_2(%arg0: i32, %arg1: i32) -> (i32, i32) {
    %c0_i32 = arith.constant 0 : i32
    %c0_i32_0 = arith.constant 0 : i32
    %c0_i32_1 = arith.constant 0 : i32
    return %c0_i32, %c0_i32_0 : i32, i32
  }
  func.func @transform_3(%arg0: i32, %arg1: i32) -> (i32, i32) {
    %c0_i32 = arith.constant 0 : i32
    %c0_i32_0 = arith.constant 0 : i32
    %c0_i32_1 = arith.constant 0 : i32
    return %c0_i32, %c0_i32_0 : i32, i32
  }
  func.func @transform_4(%arg0: i32, %arg1: i32) -> (i32, i32) {
    %c0_i32 = arith.constant 0 : i32
    %c0_i32_0 = arith.constant 0 : i32
    %c0_i32_1 = arith.constant 0 : i32
    return %c0_i32, %c0_i32_0 : i32, i32
  }
  func.func @transform_5(%arg0: i32, %arg1: i32) -> (i32, i32) {
    %c0_i32 = arith.constant 0 : i32
    %c0_i32_0 = arith.constant 0 : i32
    %c0_i32_1 = arith.constant 0 : i32
    return %c0_i32, %c0_i32_0 : i32, i32
  }
  func.func @transform_6(%arg0: i32, %arg1: i32) -> (i32, i32) {
    %c0_i32 = arith.constant 0 : i32
    %c0_i32_0 = arith.constant 0 : i32
    %c0_i32_1 = arith.constant 0 : i32
    return %c0_i32, %c0_i32_0 : i32, i32
  }
  func.func @transform_7(%arg0: i32, %arg1: i32) -> (i32, i32, i32) {
    %c0_i32 = arith.constant 0 : i32
    %c0_i32_0 = arith.constant 0 : i32
    return %arg1, %arg0, %c0_i32 : i32, i32, i32
  }
  func.func @transform_8(%arg0: i32, %arg1: i32) -> (i32, i32) {
    %c0_i32 = arith.constant 0 : i32
    %c0_i32_0 = arith.constant 0 : i32
    return %arg0, %c0_i32 : i32, i32
  }
}

</mosaic_0001>

<bundles_post_ra>
// kernel: _encoder_forward.1
= control target key start
LH: loop header
LB: loop body
LE: loop exit
PB: predicated region body
PF: predicated region fallthrough
CT: control target
= control target key end

     0   :  { %14 = vsyncpa [#allocation10], 0  ;;  %s3145_s0 = inlined_call_operand.vmem [shape: f32[8,2,4], index: 0, kind: input, shape index: {}]   ;;  %s3146_s1 = inlined_call_operand.vmem [shape: bf16[4,256], index: 1, kind: input, shape index: {}]   ;;  %s3147_s2 = inlined_call_operand.hbm [shape: bf16[64,256], index: 2, kind: input, shape index: {}]   ;;  %s3148_s3 = inlined_call_operand.hbm [shape: f32[1,256], index: 3, kind: input, shape index: {}]   ;;  %s3149_s4 = inlined_call_operand.vmem [shape: bf16[64,128], index: 4, kind: input, shape index: {}]   ;;  %s3150_s5 = inlined_call_operand.hbm [shape: bf16[32,128], index: 5, kind: input, shape index: {}]   ;;  %s3151_s6 = inlined_call_operand.hbm [shape: f32[1,128], index: 6, kind: input, shape index: {}]   ;;  %s3152_s7 = inlined_call_operand.vmem [shape: f32[8,2,32], index: 7, kind: output, shape index: {0}]   ;;  %s3153_s8 = inlined_call_operand.hbm [shape: f32[2,32], index: 8, kind: output, shape index: {1}]  }
   0x1   :  { %15 = vsyncpa [#allocation13], 0 }
   0x2   :  { %16 = vsyncpa [#allocation16], 0 }
   0x3   :  { %17 = vsyncpa [#allocation11], 0  ;;  %s2671_s27 = smov [#allocation12]   ;;  %s2672_s29 = smov [#allocation9]  }
   0x4   :  { %s40_s28 = sshll.u32 %s2671_s27, 4  ;;  %s27_s30 = sshll.u32 %s2672_s29, 4  ;;  %s41_s28 = int_to_ptr.vmem [resolvable:$true] %s40_s28  ;;  %s28_s30 = int_to_ptr.vmem [resolvable:$true] %s27_s30 }
   0x5   :  { %s2571_s9 = scalar_lea.vmem %s41_s28, 32  ;;  %p2576_p1 = scmp.lt.s32.totalorder %s41_s28, %s41_s28 }
   0x6   :  { %p2572_p0 = scmp.ne.s32.totalorder %s41_s28, %s2571_s9  ;;  %p2577_p2 = scmp.lt.s32.totalorder %s2571_s9, %s2571_s9 }
   0x8   :  { %p2578_p3 = por %p2577_p2, %p2576_p1 }
   0xa   :  { %p2579_p4 = pnand %p2578_p3, %p2572_p0 }
   0xc   :  { %2582 = shalt.err (!%p2579_p4)
}
   0xd   :  { %43 = dma.hbm_to_vmem [thread:$0]  %s3148_s3, 32, %s41_s28, [#allocation13]  }
   0xe   :  { %s2591_s12 = scalar_lea.vmem %s28_s30, 1024  ;;  %p2596_p6 = scmp.lt.s32.totalorder %s28_s30, %s28_s30 }
   0xf   :  { %p2592_p5 = scmp.ne.s32.totalorder %s28_s30, %s2591_s12  ;;  %p2597_p7 = scmp.lt.s32.totalorder %s2591_s12, %s2591_s12 }
  0x11   :  { %p2598_p8 = por %p2597_p7, %p2596_p6 }
  0x13   :  { %p2599_p9 = pnand %p2598_p8, %p2592_p5 }
  0x15   :  { %2602 = shalt.err (!%p2599_p9)
}
  0x16   :  { %s2673_s13 = smov 128   ;;  %s2674_s14 = smov 8  }
  0x17   :  { %33 = dma.hbm_to_vmem [thread:$0]  %s3147_s2, 1024, %s28_s30, [#allocation10], %s2673_s13, %s2673_s13, %s2674_s14  }
  0x18   :  { %s2675_s17 = smov [#allocation14]  }
  0x19   :  { %s51_s18 = sshll.u32 %s2675_s17, 4  ;;  %s52_s18 = int_to_ptr.vmem [resolvable:$true] %s51_s18 }
  0x1a   :  { %s2611_s19 = scalar_lea.vmem %s52_s18, 256  ;;  %p2616_p11 = scmp.lt.s32.totalorder %s52_s18, %s52_s18 }
  0x1b   :  { %p2612_p10 = scmp.ne.s32.totalorder %s52_s18, %s2611_s19  ;;  %p2617_p12 = scmp.lt.s32.totalorder %s2611_s19, %s2611_s19 }
  0x1d   :  { %p2618_p13 = por %p2617_p12, %p2616_p11 }
  0x1f   :  { %p2619_p0 = pnand %p2618_p13, %p2612_p10 }
  0x21   :  { %2622 = shalt.err (!%p2619_p0)
}
  0x22   :  { %s2676_s3 = smov 64   ;;  %s2677_s20 = smov 4  }
  0x23   :  { %57 = dma.hbm_to_vmem [thread:$0]  %s3150_s5, 256, %s52_s18, [#allocation13], %s2676_s3, %s2676_s3, %s2677_s20  }
  0x24   :  { %s2678_s23 = smov [#allocation15]  }
  0x25   :  { %s64_s2 = sshll.u32 %s2678_s23, 4  ;;  %s65_s2 = int_to_ptr.vmem [resolvable:$true] %s64_s2 }
  0x26   :  { %s2631_s24 = scalar_lea.vmem %s65_s2, 16  ;;  %s2635_s25 = scalar_lea.vmem %s65_s2, 32 }
  0x27   :  { %p2632_p1 = scmp.ne.s32.totalorder %s65_s2, %s2631_s24  ;;  %p2636_p2 = scmp.lt.s32.totalorder %s65_s2, %s65_s2 }
  0x28   :  { %p2637_p3 = scmp.lt.s32.totalorder %s2635_s25, %s2631_s24 }
  0x2a   :  { %p2638_p4 = por %p2637_p3, %p2636_p2 }
  0x2c   :  { %p2639_p5 = pnand %p2638_p4, %p2632_p1 }
  0x2e   :  { %2642 = shalt.err (!%p2639_p5)
}
  0x2f   :  { %67 = dma.hbm_to_vmem [thread:$0]  %s3151_s6, 16, %s65_s2, [#allocation16]  }
  0x30   :  { %2663 = dma.done.wait [#allocation10], 1024  }
  0x31   :  { %2664 = vsyncadd [#allocation10], 4294966272 }
  0x32   :  { %2665 = dma.done.wait [#allocation13], 288  }
  0x33   :  { %2666 = vsyncadd [#allocation13], 4294967008 }
  0x34   :  { %2667 = dma.done.wait [#allocation16], 16  }
  0x35   :  { %2668 = vsyncadd [#allocation16], 4294967280  ;;  %v112_v0 = vlaneseq  ;;  %v2679_v1 = vmov 0   ;;  %v2680_v2 = vmov 1983009808   ;;  %vm85_vm0 = vcmask 517120  }
  0x36   :  { %209 = vmatprep.mubr.bf16.mxu0 %v2679_v1  ;;  %v110_v3 = vunpack.c.l.s4 %v2680_v2  ;;  %608 = vmatprep.mubr.bf16.mxu1 %v2679_v1  ;;  %v2681_v4 = vmov 0.0   ;;  %vm170_vm1 = vcmask 1041408   ;;  %v2182_v7 = vld.sshfl [vmem:[%s3146_s1] sm:$0x33 pattern:$0x76325410] }
  0x37   :  { %86 = vst.msk [vmem:[#allocation5] sm:$0x3] %vm85_vm0, %v2681_v4  ;;  %87 = vst.msk [vmem:[#allocation6] sm:$0x3] %vm85_vm0, %v2681_v4  ;;  %v2752_v6 = vshrl.u32 %v112_v0, 7  ;;  %v165_v10 = vcombine.high %v2182_v7, %v2182_v7  ;;  %v172_v11 = vsel %vm170_vm1, %v2182_v7, 0 }
  0x38   :  { %v111_v5 = vunpack.c.0.s8 %v110_v3  ;;  %v91_v8 = vld [vmem:[%s3145_s0] sm:$0x3]  ;;  %v92_v12 = vld [vmem:[%s3145_s0 + $0x2] sm:$0x3]  ;;  %v93_v13 = vld [vmem:[%s3145_s0 + $0x4] sm:$0x3] }
  0x39   :  { %v94_v14 = vld [vmem:[%s3145_s0 + $0x6] sm:$0x3]  ;;  %v95_v15 = vld [vmem:[%s3145_s0 + $0x8] sm:$0x3]  ;;  %v96_v16 = vld [vmem:[%s3145_s0 + $0xa] sm:$0x3]  ;;  %v107_v17 = vcombine.low %v91_v8, %v92_v12  ;;  %2183 = vmatprep.subr.msk.bf16.mxu0 %vm170_vm1, %v165_v10 }
  0x3a   :  { %v2761_v9 = vsub.s32 %v111_v5, %v2752_v6  ;;  %v97_v18 = vld [vmem:[%s3145_s0 + $0xc] sm:$0x3]  ;;  %v98_v19 = vld [vmem:[%s3145_s0 + $0xe] sm:$0x3]  ;;  %v108_v20 = vcombine.low %v93_v13, %v94_v14  ;;  %v124_v21 = vcombine.low %v95_v15, %v96_v16  ;;  %192 = vmatpush1.bf16.msra.mxu0 %v172_v11  ;;  %v2787_v25 = vld [vmem:[#allocation9 + $0x30] ss:$8 sps:$4 sm:$0xff]  }
  0x3b   :  { %v125_v23 = vcombine.low %v97_v18, %v98_v19  ;;  %v2785_v24 = vld [vmem:[#allocation9 + $0x34] ss:$8 sps:$4 sm:$0xff]   ;;  %v2791_v28 = vld [vmem:[#allocation9 + $0x24] ss:$8 sps:$4 sm:$0xff]   ;;  %v2797_v31 = vld [vmem:[#allocation9 + $0x20] ss:$8 sps:$4 sm:$0xff]  }
  0x3c   :  { %v115_v22 = vrot.slane %v107_v17, %v2761_v9  ;;  %v122_v26 = vrot.slane %v108_v20, %v2761_v9  ;;  %v132_v27 = vrot.slane %v124_v21, %v2761_v9  ;;  %584 = vmatprep.subr.bf16.mxu1 %v2785_v24  ;;  %679 = vmatprep.subr.bf16.mxu0 %v2785_v24  ;;  %vm166_vm2 = vcmask 31744   ;;  %v2800_v33 = vld [vmem:[#allocation9 + $0x14] ss:$8 sps:$4 sm:$0xff]   ;;  %v2802_v34 = vld [vmem:[#allocation9 + $0x10] ss:$8 sps:$4 sm:$0xff]   ;;  %s2685_s9 = smov 96  }
  0x3d   :  { %v139_v29 = vrot.slane %v125_v23, %v2761_v9  ;;  %585 = vmatpush1.bf16.msra.mxu1 %v2787_v25  ;;  %v2804_v36 = vld [vmem:[#allocation9 + $0x4] ss:$8 sps:$4 sm:$0xff]   ;;  %v2812_v37 = vld [vmem:[#allocation9] ss:$8 sps:$4 sm:$0xff]   ;;  %vm572_vm3 = vcmask 523264   ;;  %v149_v40 = vsub.s32 0, %v2752_v6 }
  0x3e   :  { %v123_v30 = vcombine.low %v115_v22, %v122_v26  ;;  %586 = vmatprep.subr.bf16.mxu1 %v2791_v28  ;;  %v516_v38 = vld [vmem:[#allocation5] sm:$0x3]  ;;  %v153_v41 = vsub.s32 1, %v2752_v6  ;;  %v145_v42 = vld [vmem:[#allocation12] sm:$0x3]  ;;  %vm2683_vm4 = vmmov 0  }
  0x3f   :  { %v140_v32 = vcombine.low %v132_v27, %v139_v29  ;;  %v518_v39 = vpack.c.bf16 %v516_v38, %v516_v38  ;;  %v150_v43 = vrot.slane %v145_v42, %v149_v40  ;;  %v2682_v47 = vmov 1966171168  }
  0x40   :  { %v154_v44 = vrot.slane %v145_v42, %v153_v41  ;;  %v374_v48 = vunpack.c.l.s4 %v2682_v47  ;;  %vm88_vm5 = vcmask 254976   ;;  %vm1513_vm6 = vcmask 261120  }
  0x41   :  { %v143_v35 = vpack.c.bf16 %v140_v32, %v123_v30  ;;  %587 = vmatpush1.bf16.msra.mxu1 %v2797_v31  ;;  %89 = vst.msk [vmem:[#allocation7] sm:$0x3] %vm88_vm5, %v2681_v4  ;;  %90 = vst.msk [vmem:[#allocation8] sm:$0x3] %vm88_vm5, %v2681_v4 }
  0x42   :  { %588 = vmatprep.subr.bf16.mxu1 %v2800_v33  ;;  %v375_v54 = vunpack.c.0.s8 %v374_v48 }
  0x43   :  { %2184 = vmatmul.mubr.msk.bf16.vlgmr.msra.gmra.mxu0 %vm166_vm2, %v143_v35 }
  0x44   :  { %680 = vmatpush1.bf16.msra.mxu0 %v2787_v25  ;;  %703 = vmatprep.mubr.bf16.mxu0 %v2679_v1  ;;  %v378_v0 = vsub.s32 %v375_v54, %v2752_v6 }
  0x45   :  { %681 = vmatprep.subr.bf16.mxu0 %v2791_v28  ;;  %589 = vmatpush1.bf16.msra.mxu1 %v2802_v34 }
  0x46   :  { %590 = vmatprep.subr.bf16.mxu1 %v2804_v36 }
  0x48   :  { %682 = vmatpush1.bf16.msra.mxu0 %v2797_v31 }
  0x49   :  { %683 = vmatprep.subr.bf16.mxu0 %v2800_v33  ;;  %591 = vmatpush1.bf16.msra.mxu1 %v2812_v37 }
  0x4a   :  { %770 = vmatprep.subr.bf16.mxu1 %v2785_v24 }
  0x4c   :  { %684 = vmatpush1.bf16.msra.mxu0 %v2802_v34  ;;  %2209 = vmatmul.mubr.msk.bf16.vlgmr.msra.gmra.mxu1 %vm572_vm3, %v518_v39 }
  0x4d   :  { %685 = vmatprep.subr.bf16.mxu0 %v2804_v36  ;;  %771 = vmatpush1.bf16.msra.mxu1 %v2787_v25 }
  0x4e   :  { %794 = vmatprep.mubr.bf16.mxu1 %v2679_v1  ;;  %772 = vmatprep.subr.bf16.mxu1 %v2791_v28 }
  0x50   :  { %686 = vmatpush1.bf16.msra.mxu0 %v2812_v37 }
  0x51   :  { %861 = vmatprep.subr.bf16.mxu0 %v2785_v24  ;;  %773 = vmatpush1.bf16.msra.mxu1 %v2797_v31 }
  0x52   :  { %774 = vmatprep.subr.bf16.mxu1 %v2800_v33 }
  0x55   :  { %775 = vmatpush1.bf16.msra.mxu1 %v2802_v34 }
  0x56   :  { %776 = vmatprep.subr.bf16.mxu1 %v2804_v36 }
  0x59   :  { %777 = vmatpush1.bf16.msra.mxu1 %v2812_v37 }
  0x5a   :  { %952 = vmatprep.subr.bf16.mxu1 %v2785_v24 }
 0x103   :  { %v211_v45 = vpop.f32.mrf.mxu0 }
 0x104   :  { %v212_v49 = vadd.f32 %v211_v45, %v150_v43 }
 0x105   :  { %v213_v46 = vpop.f32.mrf.mxu0 }
 0x106   :  { %v214_v50 = vadd.f32 %v213_v46, %v154_v44 }
 0x107   :  { %v215_v51 = vpop.f32.mrf.mxu0 }
 0x108   :  { %v224_v52 = vcombine.low %v212_v49, %v214_v50  ;;  %v225_v53 = vcombine.high %v212_v49, %v214_v50  ;;  %v216_v59 = vadd.f32 %v215_v51, %v150_v43 }
 0x109   :  { %v217_v55 = vpop.f32.mrf.mxu0 }
 0x10a   :  { %v232_v56 = vrot.slane %v224_v52, %v2761_v9  ;;  %v239_v57 = vrot.slane %v225_v53, %v2761_v9  ;;  %v218_v58 = vadd.f32 %v217_v55, %v154_v44 }
 0x10c   :  { %v240_v60 = vcombine.high %v232_v56, %v232_v56  ;;  %v241_v61 = vcombine.high %v239_v57, %v239_v57  ;;  %v266_v62 = vrot.slane %v232_v56, %v2761_v9  ;;  %v282_v63 = vrot.slane %v239_v57, %v2761_v9  ;;  %v610_v5 = vpop.f32.mrf.mxu1 }
 0x10d   :  { %v242_v2 = vcombine.low %v216_v59, %v218_v58  ;;  %v243_v3 = vcombine.high %v216_v59, %v218_v58  ;;  %v517_v59 = vld [vmem:[#allocation6] sm:$0x3] }
 0x10e   :  { %v267_v7 = vcombine.high %v266_v62, %v266_v62  ;;  %v274_v8 = vrot.slane %v240_v60, %v2761_v9  ;;  %v283_v10 = vcombine.high %v282_v63, %v282_v63  ;;  %v290_v11 = vrot.slane %v241_v61, %v2761_v9  ;;  %v612_v14 = vpop.f32.mrf.mxu1 }
 0x10f   :  { %v250_v12 = vrot.slane %v242_v2, %v2761_v9  ;;  %v257_v13 = vrot.slane %v243_v3, %v2761_v9 }
 0x110   :  { %v275_v15 = vcombine.high %v274_v8, %v274_v8  ;;  %v291_v16 = vcombine.high %v290_v11, %v290_v11  ;;  %v2185_v17 = vpack.c.bf16 %v267_v7, %v266_v62  ;;  %v2187_v18 = vpack.c.bf16 %v283_v10, %v282_v63  ;;  %v614_v22 = vpop.f32.mrf.mxu1 }
 0x111   :  { %v258_v19 = vcombine.high %v250_v12, %v250_v12  ;;  %v259_v6 = vcombine.high %v257_v13, %v257_v13  ;;  %v298_v20 = vrot.slane %v250_v12, %v2761_v9  ;;  %v314_v21 = vrot.slane %v257_v13, %v2761_v9 }
 0x112   :  { %v379_v23 = vrot.slane %v2185_v17, %v378_v0  ;;  %v2186_v26 = vpack.c.bf16 %v275_v15, %v274_v8  ;;  %v409_v27 = vrot.slane %v2187_v18, %v378_v0  ;;  %v2188_v29 = vpack.c.bf16 %v291_v16, %v290_v11  ;;  %v615_v39 = vpop.f32.mrf.mxu1 }
 0x113   :  { %v299_v30 = vcombine.high %v298_v20, %v298_v20  ;;  %v306_v32 = vrot.slane %v258_v19, %v2761_v9  ;;  %v315_v35 = vcombine.high %v314_v21, %v314_v21  ;;  %v322_v38 = vrot.slane %v259_v6, %v2761_v9 }
 0x114   :  { %v394_v40 = vrot.slane %v2186_v26, %v378_v0  ;;  %v424_v41 = vrot.slane %v2188_v29, %v378_v0  ;;  %2193 = vst.sshfl [vmem:[#allocation2] sm:$0x5 pattern:$0x73625140] %v379_v23 }
 0x115   :  { %2195 = vst.sshfl [vmem:[#allocation2 + $0x4] sm:$0x5 pattern:$0x73625140] %v409_v27  ;;  %v307_v42 = vcombine.high %v306_v32, %v306_v32  ;;  %v323_v43 = vcombine.high %v322_v38, %v322_v38  ;;  %v2189_v44 = vpack.c.bf16 %v299_v30, %v298_v20  ;;  %v2191_v45 = vpack.c.bf16 %v315_v35, %v314_v21 }
 0x116   :  { %2194 = vst.sshfl [vmem:[#allocation2 + $0x2] sm:$0x5 pattern:$0x73625140] %v394_v40 }
 0x117   :  { %2196 = vst.sshfl [vmem:[#allocation2 + $0x6] sm:$0x5 pattern:$0x73625140] %v424_v41  ;;  %v439_v46 = vrot.slane %v2189_v44, %v378_v0  ;;  %v2190_v47 = vpack.c.bf16 %v307_v42, %v306_v32  ;;  %v469_v48 = vrot.slane %v2191_v45, %v378_v0  ;;  %v2192_v49 = vpack.c.bf16 %v323_v43, %v322_v38 }
 0x119   :  { %v454_v50 = vrot.slane %v2190_v47, %v378_v0  ;;  %v484_v51 = vrot.slane %v2192_v49, %v378_v0  ;;  %2197 = vst.sshfl [vmem:[#allocation2 + $0x8] sm:$0x5 pattern:$0x73625140] %v439_v46 }
 0x11a   :  { %2199 = vst.sshfl [vmem:[#allocation2 + $0xc] sm:$0x5 pattern:$0x73625140] %v469_v48 }
 0x11b   :  { %2198 = vst.sshfl [vmem:[#allocation2 + $0xa] sm:$0x5 pattern:$0x73625140] %v454_v50  ;;  %v519_v52 = vld [vmem:[#allocation2] sm:$0x3] }
 0x11c   :  { %2200 = vst.sshfl [vmem:[#allocation2 + $0xe] sm:$0x5 pattern:$0x73625140] %v484_v51  ;;  %v520_v53 = vunpack.c.l.bf16 %v519_v52 }
 0x11d   :  { %v655_v18 = vld [vmem:[#allocation2 + $0x2] sm:$0x3] }
 0x11e   :  { %v568_v54 = vrot.slane %v520_v53, %v2761_v9  ;;  %v656_v19 = vunpack.c.l.bf16 %v655_v18  ;;  %v746_v53 = vld [vmem:[#allocation2 + $0x4] sm:$0x3] }
 0x120   :  { %v611_v55 = vadd.f32 %v610_v5, %v568_v54  ;;  %v569_v56 = vcombine.high %v568_v54, %v568_v54  ;;  %v664_v6 = vrot.slane %v656_v19, %v2761_v9  ;;  %v747_v54 = vunpack.c.l.bf16 %v746_v53 }
 0x122   :  { %v613_v57 = vadd.f32 %v612_v14, %v569_v56  ;;  %v2210_v60 = vmul.f32 -1.442695, %v611_v55  ;;  %v665_v21 = vcombine.high %v664_v6, %v664_v6  ;;  %v755_v55 = vrot.slane %v747_v54, %v2761_v9 }
 0x124   :  { %2403 = vtanh.f32 %v613_v57  ;;  %v2211_v11 = vmul.f32 -1.442695, %v613_v57  ;;  %v756_v57 = vcombine.high %v755_v55, %v755_v55 }
 0x125   :  { %2405 = vpow2.f32 %v2210_v60 }
 0x131   :  { %v2404_v58 = vpop.eup %2403 }
 0x132   :  { %636 = vrot.lane.b32.xlu0 %v2404_v58, %s2676_s3  ;;  %v2406_v61 = vpop.eup %2405 }
 0x133   :  { %v623_v62 = vadd.f32 1.0, %v2406_v61 }
 0x135   :  { %2407 = vrcp.f32 %v623_v62 }
 0x136   :  { %631 = vrot.lane.b32.xlu0 %v517_v59, %s2676_s3 }
 0x142   :  { %v2408_v63 = vpop.eup %2407 }
 0x1a4   :  { %v637_v0 = vpop.permute.xlu0 %636 }
 0x1a5   :  { %v639_v2 = vmul.f32 %v2408_v63, %v637_v0 }
 0x1a7   :  { %641 = vrot.lane.b32.xlu1 %v639_v2, %s2676_s3 }
 0x1a8   :  { %v632_v3 = vpop.permute.xlu0 %631 }
 0x1a9   :  { %v634_v5 = vmul.f32 %v2408_v63, %v632_v3 }
 0x219   :  { %v642_v7 = vpop.permute.xlu1 %641 }
 0x21a   :  { %v644_v8 = vadd.f32 %v642_v7, %v634_v5 }
 0x21c   :  { %2409 = vtanh.f32 %v644_v8 }
 0x21d   :  { %2411 = vpow2.f32 %v2211_v11 }
 0x229   :  { %v2410_v10 = vpop.eup %2409 }
 0x22a   :  { %647 = vrot.lane.b32.xlu1 %v2410_v10, %s2676_s3  ;;  %v2412_v12 = vpop.eup %2411 }
 0x22b   :  { %v624_v13 = vadd.f32 1.0, %v2412_v12 }
 0x22d   :  { %2413 = vrcp.f32 %v624_v13 }
 0x23a   :  { %v2414_v14 = vpop.eup %2413 }
 0x29c   :  { %v648_v15 = vpop.permute.xlu1 %647 }
 0x29d   :  { %v650_v16 = vmul.f32 %v2414_v14, %v648_v15 }
 0x29f   :  { %652 = vst.msk [vmem:[#allocation3] sm:$0x3] %vm85_vm0, %v650_v16  ;;  %v653_v17 = vpack.c.bf16 %v650_v16, %v650_v16 }
 0x2a1   :  { %2212 = vmatmul.mubr.msk.bf16.vlgmr.msra.gmra.mxu0 %vm572_vm3, %v653_v17 }
 0x2a2   :  { %862 = vmatpush1.bf16.msra.mxu0 %v2787_v25  ;;  %885 = vmatprep.mubr.bf16.mxu0 %v2679_v1 }
 0x2a3   :  { %863 = vmatprep.subr.bf16.mxu0 %v2791_v28 }
 0x2a6   :  { %864 = vmatpush1.bf16.msra.mxu0 %v2797_v31 }
 0x2a7   :  { %865 = vmatprep.subr.bf16.mxu0 %v2800_v33 }
 0x2aa   :  { %866 = vmatpush1.bf16.msra.mxu0 %v2802_v34 }
 0x2ab   :  { %867 = vmatprep.subr.bf16.mxu0 %v2804_v36 }
 0x2ae   :  { %868 = vmatpush1.bf16.msra.mxu0 %v2812_v37 }
 0x2af   :  { %1043 = vmatprep.subr.bf16.mxu0 %v2785_v24 }
 0x361   :  { %v705_v20 = vpop.f32.mrf.mxu0 }
 0x362   :  { %v706_v30 = vadd.f32 %v705_v20, %v664_v6  ;;  %v837_v20 = vld [vmem:[#allocation2 + $0x6] sm:$0x3] }
 0x363   :  { %v707_v22 = vpop.f32.mrf.mxu0 }
 0x364   :  { %v708_v23 = vadd.f32 %v707_v22, %v665_v21  ;;  %v2213_v32 = vmul.f32 -1.442695, %v706_v30  ;;  %v838_v21 = vunpack.c.l.bf16 %v837_v20 }
 0x365   :  { %v709_v26 = vpop.f32.mrf.mxu0 }
 0x366   :  { %2415 = vtanh.f32 %v708_v23  ;;  %v2214_v46 = vmul.f32 -1.442695, %v708_v23  ;;  %v846_v22 = vrot.slane %v838_v21, %v2761_v9 }
 0x367   :  { %v710_v27 = vpop.f32.mrf.mxu0  ;;  %2417 = vpow2.f32 %v2213_v32 }
 0x368   :  { %v847_v26 = vcombine.high %v846_v22, %v846_v22 }
 0x373   :  { %v2416_v29 = vpop.eup %2415 }
 0x374   :  { %727 = vrot.lane.b32.xlu0 %v2416_v29, %s2676_s3  ;;  %v2418_v35 = vpop.eup %2417 }
 0x375   :  { %v718_v38 = vadd.f32 1.0, %v2418_v35 }
 0x377   :  { %2419 = vrcp.f32 %v718_v38 }
 0x384   :  { %v2420_v39 = vpop.eup %2419 }
 0x385   :  { %v725_v42 = vmul.f32 %v2420_v39, %v644_v8 }
 0x3e6   :  { %v728_v40 = vpop.permute.xlu0 %727 }
 0x3e7   :  { %v730_v41 = vmul.f32 %v2420_v39, %v728_v40 }
 0x3e9   :  { %732 = vrot.lane.b32.xlu1 %v730_v41, %s2676_s3 }
 0x45b   :  { %v733_v43 = vpop.permute.xlu1 %732 }
 0x45c   :  { %v735_v44 = vadd.f32 %v733_v43, %v725_v42 }
 0x45e   :  { %2421 = vtanh.f32 %v735_v44 }
 0x45f   :  { %2423 = vpow2.f32 %v2214_v46 }
 0x46b   :  { %v2422_v45 = vpop.eup %2421 }
 0x46c   :  { %738 = vrot.lane.b32.xlu0 %v2422_v45, %s2676_s3  ;;  %v2424_v47 = vpop.eup %2423 }
 0x46d   :  { %v719_v48 = vadd.f32 1.0, %v2424_v47 }
 0x46f   :  { %2425 = vrcp.f32 %v719_v48 }
 0x47c   :  { %v2426_v49 = vpop.eup %2425 }
 0x4de   :  { %v739_v50 = vpop.permute.xlu0 %738 }
 0x4df   :  { %v741_v51 = vmul.f32 %v2426_v49, %v739_v50 }
 0x4e1   :  { %743 = vst.msk [vmem:[#allocation3 + $0x2] sm:$0x3] %vm85_vm0, %v741_v51  ;;  %v744_v52 = vpack.c.bf16 %v741_v51, %v741_v51 }
 0x4e3   :  { %2215 = vmatmul.mubr.msk.bf16.vlgmr.msra.gmra.mxu1 %vm572_vm3, %v744_v52 }
 0x4e4   :  { %953 = vmatpush1.bf16.msra.mxu1 %v2787_v25  ;;  %976 = vmatprep.mubr.bf16.mxu1 %v2679_v1 }
 0x4e5   :  { %954 = vmatprep.subr.bf16.mxu1 %v2791_v28 }
 0x4e8   :  { %955 = vmatpush1.bf16.msra.mxu1 %v2797_v31 }
 0x4e9   :  { %956 = vmatprep.subr.bf16.mxu1 %v2800_v33 }
 0x4ec   :  { %957 = vmatpush1.bf16.msra.mxu1 %v2802_v34 }
 0x4ed   :  { %958 = vmatprep.subr.bf16.mxu1 %v2804_v36 }
 0x4f0   :  { %959 = vmatpush1.bf16.msra.mxu1 %v2812_v37 }
 0x4f1   :  { %1134 = vmatprep.subr.bf16.mxu1 %v2785_v24 }
 0x5a3   :  { %v796_v56 = vpop.f32.mrf.mxu1 }
 0x5a4   :  { %v797_v63 = vadd.f32 %v796_v56, %v755_v55  ;;  %v928_v55 = vld [vmem:[#allocation2 + $0x8] sm:$0x3] }
 0x5a5   :  { %v798_v58 = vpop.f32.mrf.mxu1  ;;  %v929_v56 = vunpack.c.l.bf16 %v928_v55 }
 0x5a6   :  { %v799_v59 = vadd.f32 %v798_v58, %v756_v57  ;;  %v2216_v0 = vmul.f32 -1.442695, %v797_v63 }
 0x5a7   :  { %v800_v60 = vpop.f32.mrf.mxu1  ;;  %v937_v57 = vrot.slane %v929_v56, %v2761_v9 }
 0x5a8   :  { %2427 = vtanh.f32 %v799_v59  ;;  %v2217_v14 = vmul.f32 -1.442695, %v799_v59 }
 0x5a9   :  { %v801_v61 = vpop.f32.mrf.mxu1  ;;  %2429 = vpow2.f32 %v2216_v0  ;;  %v938_v59 = vcombine.high %v937_v57, %v937_v57 }
 0x5b5   :  { %v2428_v62 = vpop.eup %2427 }
 0x5b6   :  { %818 = vrot.lane.b32.xlu1 %v2428_v62, %s2676_s3  ;;  %v2430_v2 = vpop.eup %2429 }
 0x5b7   :  { %v809_v3 = vadd.f32 1.0, %v2430_v2 }
 0x5b9   :  { %2431 = vrcp.f32 %v809_v3 }
 0x5c6   :  { %v2432_v5 = vpop.eup %2431 }
 0x5c7   :  { %v816_v10 = vmul.f32 %v2432_v5, %v735_v44 }
 0x628   :  { %v819_v7 = vpop.permute.xlu1 %818 }
 0x629   :  { %v821_v8 = vmul.f32 %v2432_v5, %v819_v7 }
 0x62b   :  { %823 = vrot.lane.b32.xlu0 %v821_v8, %s2676_s3 }
 0x69d   :  { %v824_v11 = vpop.permute.xlu0 %823 }
 0x69e   :  { %v826_v12 = vadd.f32 %v824_v11, %v816_v10 }
 0x6a0   :  { %2433 = vtanh.f32 %v826_v12 }
 0x6a1   :  { %2435 = vpow2.f32 %v2217_v14 }
 0x6ad   :  { %v2434_v13 = vpop.eup %2433 }
 0x6ae   :  { %829 = vrot.lane.b32.xlu1 %v2434_v13, %s2676_s3  ;;  %v2436_v15 = vpop.eup %2435 }
 0x6af   :  { %v810_v16 = vadd.f32 1.0, %v2436_v15 }
 0x6b1   :  { %2437 = vrcp.f32 %v810_v16 }
 0x6be   :  { %v2438_v17 = vpop.eup %2437 }
 0x720   :  { %v830_v18 = vpop.permute.xlu1 %829 }
 0x721   :  { %v832_v19 = vmul.f32 %v2438_v17, %v830_v18 }
 0x723   :  { %834 = vst.msk [vmem:[#allocation3 + $0x4] sm:$0x3] %vm85_vm0, %v832_v19  ;;  %v835_v6 = vpack.c.bf16 %v832_v19, %v832_v19 }
 0x725   :  { %2218 = vmatmul.mubr.msk.bf16.vlgmr.msra.gmra.mxu0 %vm572_vm3, %v835_v6 }
 0x726   :  { %1044 = vmatpush1.bf16.msra.mxu0 %v2787_v25  ;;  %1067 = vmatprep.mubr.bf16.mxu0 %v2679_v1 }
 0x727   :  { %1045 = vmatprep.subr.bf16.mxu0 %v2791_v28 }
 0x72a   :  { %1046 = vmatpush1.bf16.msra.mxu0 %v2797_v31 }
 0x72b   :  { %1047 = vmatprep.subr.bf16.mxu0 %v2800_v33 }
 0x72e   :  { %1048 = vmatpush1.bf16.msra.mxu0 %v2802_v34 }
 0x72f   :  { %1049 = vmatprep.subr.bf16.mxu0 %v2804_v36 }
 0x732   :  { %1050 = vmatpush1.bf16.msra.mxu0 %v2812_v37 }
 0x733   :  { %1225 = vmatprep.subr.bf16.mxu0 %v2785_v24 }
 0x7e5   :  { %v887_v23 = vpop.f32.mrf.mxu0 }
 0x7e6   :  { %v888_v38 = vadd.f32 %v887_v23, %v846_v22  ;;  %v1019_v22 = vld [vmem:[#allocation2 + $0xa] sm:$0x3] }
 0x7e7   :  { %v889_v27 = vpop.f32.mrf.mxu0  ;;  %v1020_v23 = vunpack.c.l.bf16 %v1019_v22 }
 0x7e8   :  { %v890_v29 = vadd.f32 %v889_v27, %v847_v26  ;;  %v2219_v39 = vmul.f32 -1.442695, %v888_v38 }
 0x7e9   :  { %v891_v30 = vpop.f32.mrf.mxu0 }
 0x7ea   :  { %2439 = vtanh.f32 %v890_v29  ;;  %v2220_v48 = vmul.f32 -1.442695, %v890_v29 }
 0x7eb   :  { %v892_v32 = vpop.f32.mrf.mxu0  ;;  %2441 = vpow2.f32 %v2219_v39 }
 0x7f7   :  { %v2440_v35 = vpop.eup %2439 }
 0x7f8   :  { %909 = vrot.lane.b32.xlu0 %v2440_v35, %s2676_s3  ;;  %v2442_v40 = vpop.eup %2441 }
 0x7f9   :  { %v900_v41 = vadd.f32 1.0, %v2442_v40 }
 0x7fb   :  { %2443 = vrcp.f32 %v900_v41 }
 0x808   :  { %v2444_v24 = vpop.eup %2443 }
 0x809   :  { %v907_v44 = vmul.f32 %v2444_v24, %v826_v12 }
 0x86a   :  { %v910_v42 = vpop.permute.xlu0 %909 }
 0x86b   :  { %v912_v43 = vmul.f32 %v2444_v24, %v910_v42 }
 0x86d   :  { %914 = vrot.lane.b32.xlu1 %v912_v43, %s2676_s3 }
 0x8df   :  { %v915_v45 = vpop.permute.xlu1 %914 }
 0x8e0   :  { %v917_v46 = vadd.f32 %v915_v45, %v907_v44 }
 0x8e2   :  { %2445 = vtanh.f32 %v917_v46 }
 0x8e3   :  { %2447 = vpow2.f32 %v2220_v48 }
 0x8ef   :  { %v2446_v47 = vpop.eup %2445 }
 0x8f0   :  { %920 = vrot.lane.b32.xlu0 %v2446_v47, %s2676_s3  ;;  %v2448_v49 = vpop.eup %2447 }
 0x8f1   :  { %v901_v50 = vadd.f32 1.0, %v2448_v49  ;;  %v1110_v49 = vld [vmem:[#allocation2 + $0xc] sm:$0x3] }
 0x8f3   :  { %2449 = vrcp.f32 %v901_v50  ;;  %v1111_v50 = vunpack.c.l.bf16 %v1110_v49 }
 0x900   :  { %v2450_v51 = vpop.eup %2449 }
 0x962   :  { %v921_v52 = vpop.permute.xlu0 %920 }
 0x963   :  { %v923_v53 = vmul.f32 %v2450_v51, %v921_v52  ;;  %v1119_v51 = vrot.slane %v1111_v50, %v2761_v9 }
 0x965   :  { %925 = vst.msk [vmem:[#allocation3 + $0x6] sm:$0x3] %vm85_vm0, %v923_v53  ;;  %v926_v54 = vpack.c.bf16 %v923_v53, %v923_v53  ;;  %v1120_v53 = vcombine.high %v1119_v51, %v1119_v51 }
 0x967   :  { %2221 = vmatmul.mubr.msk.bf16.vlgmr.msra.gmra.mxu1 %vm572_vm3, %v926_v54 }
 0x968   :  { %1135 = vmatpush1.bf16.msra.mxu1 %v2787_v25  ;;  %1158 = vmatprep.mubr.bf16.mxu1 %v2679_v1 }
 0x969   :  { %1136 = vmatprep.subr.bf16.mxu1 %v2791_v28 }
 0x96c   :  { %1137 = vmatpush1.bf16.msra.mxu1 %v2797_v31 }
 0x96d   :  { %1138 = vmatprep.subr.bf16.mxu1 %v2800_v33 }
 0x970   :  { %1139 = vmatpush1.bf16.msra.mxu1 %v2802_v34 }
 0x971   :  { %1140 = vmatprep.subr.bf16.mxu1 %v2804_v36 }
 0x974   :  { %1141 = vmatpush1.bf16.msra.mxu1 %v2812_v37 }
 0x975   :  { %2293 = vmatprep.subr.bf16.mxu1 %v2681_v4 }
 0xa27   :  { %v978_v58 = vpop.f32.mrf.mxu1 }
 0xa28   :  { %v979_v2 = vadd.f32 %v978_v58, %v937_v57 }
 0xa29   :  { %v980_v60 = vpop.f32.mrf.mxu1 }
 0xa2a   :  { %v981_v61 = vadd.f32 %v980_v60, %v938_v59  ;;  %v2222_v3 = vmul.f32 -1.442695, %v979_v2 }
 0xa2b   :  { %v982_v62 = vpop.f32.mrf.mxu1 }
 0xa2c   :  { %2451 = vtanh.f32 %v981_v61  ;;  %v2223_v16 = vmul.f32 -1.442695, %v981_v61 }
 0xa2d   :  { %v983_v63 = vpop.f32.mrf.mxu1  ;;  %2453 = vpow2.f32 %v2222_v3 }
 0xa39   :  { %v2452_v0 = vpop.eup %2451 }
 0xa3a   :  { %1000 = vrot.lane.b32.xlu1 %v2452_v0, %s2676_s3  ;;  %v2454_v5 = vpop.eup %2453 }
 0xa3b   :  { %v991_v7 = vadd.f32 1.0, %v2454_v5 }
 0xa3d   :  { %2455 = vrcp.f32 %v991_v7 }
 0xa4a   :  { %v2456_v8 = vpop.eup %2455 }
 0xa4b   :  { %v998_v12 = vmul.f32 %v2456_v8, %v917_v46 }
 0xaac   :  { %v1001_v10 = vpop.permute.xlu1 %1000 }
 0xaad   :  { %v1003_v11 = vmul.f32 %v2456_v8, %v1001_v10 }
 0xaaf   :  { %1005 = vrot.lane.b32.xlu0 %v1003_v11, %s2676_s3 }
 0xb21   :  { %v1006_v13 = vpop.permute.xlu0 %1005 }
 0xb22   :  { %v1008_v14 = vadd.f32 %v1006_v13, %v998_v12 }
 0xb24   :  { %2457 = vtanh.f32 %v1008_v14 }
 0xb25   :  { %2459 = vpow2.f32 %v2223_v16 }
 0xb31   :  { %v2458_v15 = vpop.eup %2457 }
 0xb32   :  { %1011 = vrot.lane.b32.xlu1 %v2458_v15, %s2676_s3  ;;  %v2460_v17 = vpop.eup %2459 }
 0xb33   :  { %v992_v18 = vadd.f32 1.0, %v2460_v17  ;;  %v1201_v17 = vld [vmem:[#allocation2 + $0xe] sm:$0x3] }
 0xb35   :  { %2461 = vrcp.f32 %v992_v18  ;;  %v1202_v18 = vunpack.c.l.bf16 %v1201_v17 }
 0xb42   :  { %v2462_v19 = vpop.eup %2461 }
 0xba4   :  { %v1012_v6 = vpop.permute.xlu1 %1011 }
 0xba5   :  { %v1014_v20 = vmul.f32 %v2462_v19, %v1012_v6  ;;  %v1210_v19 = vrot.slane %v1202_v18, %v2761_v9 }
 0xba7   :  { %1016 = vst.msk [vmem:[#allocation3 + $0x8] sm:$0x3] %vm85_vm0, %v1014_v20  ;;  %v1017_v21 = vpack.c.bf16 %v1014_v20, %v1014_v20  ;;  %v1211_v20 = vcombine.high %v1210_v19, %v1210_v19 }
 0xba9   :  { %2224 = vmatmul.mubr.msk.bf16.vlgmr.msra.gmra.mxu0 %vm572_vm3, %v1017_v21 }
 0xbaa   :  { %1226 = vmatpush1.bf16.msra.mxu0 %v2787_v25  ;;  %1249 = vmatprep.mubr.bf16.mxu0 %v2679_v1  ;;  %v1028_v25 = vrot.slane %v1020_v23, %v2761_v9 }
 0xbab   :  { %1227 = vmatprep.subr.bf16.mxu0 %v2791_v28 }
 0xbac   :  { %v1029_v1 = vcombine.high %v1028_v25, %v1028_v25 }
 0xbae   :  { %1228 = vmatpush1.bf16.msra.mxu0 %v2797_v31 }
 0xbaf   :  { %1229 = vmatprep.subr.bf16.mxu0 %v2800_v33 }
 0xbb2   :  { %1230 = vmatpush1.bf16.msra.mxu0 %v2802_v34 }
 0xbb3   :  { %1231 = vmatprep.subr.bf16.mxu0 %v2804_v36 }
 0xbb6   :  { %1232 = vmatpush1.bf16.msra.mxu0 %v2812_v37 }
 0xbb7   :  { %2305 = vmatprep.subr.bf16.mxu0 %v2681_v4 }
 0xc69   :  { %v1069_v26 = vpop.f32.mrf.mxu0 }
 0xc6a   :  { %v1070_v34 = vadd.f32 %v1069_v26, %v1028_v25 }
 0xc6b   :  { %v1071_v27 = vpop.f32.mrf.mxu0 }
 0xc6c   :  { %v1072_v28 = vadd.f32 %v1071_v27, %v1029_v1  ;;  %v2225_v36 = vmul.f32 -1.442695, %v1070_v34 }
 0xc6d   :  { %v1073_v29 = vpop.f32.mrf.mxu0 }
 0xc6e   :  { %2463 = vtanh.f32 %v1072_v28  ;;  %v2226_v42 = vmul.f32 -1.442695, %v1072_v28 }
 0xc6f   :  { %v1074_v31 = vpop.f32.mrf.mxu0  ;;  %2465 = vpow2.f32 %v2225_v36 }
 0xc7b   :  { %v2464_v33 = vpop.eup %2463 }
 0xc7c   :  { %1091 = vrot.lane.b32.xlu0 %v2464_v33, %s2676_s3  ;;  %v2466_v37 = vpop.eup %2465 }
 0xc7d   :  { %v1082_v30 = vadd.f32 1.0, %v2466_v37 }
 0xc7f   :  { %2467 = vrcp.f32 %v1082_v30 }
 0xc8c   :  { %v2468_v32 = vpop.eup %2467 }
 0xc8d   :  { %v1089_v39 = vmul.f32 %v2468_v32, %v1008_v14 }
 0xcee   :  { %v1092_v35 = vpop.permute.xlu0 %1091 }
 0xcef   :  { %v1094_v38 = vmul.f32 %v2468_v32, %v1092_v35  ;;  %v2397_v32 = vld [vmem:[%s3149_s4 + $0x18] sm:$0xff]   ;;  %v2398_v35 = vld [vmem:[%s3149_s4 + $0x10] sm:$0xff]  }
 0xcf1   :  { %1096 = vrot.lane.b32.xlu1 %v1094_v38, %s2676_s3  ;;  %v2399_v38 = vld [vmem:[%s3149_s4 + $0x8] sm:$0xff]  }
 0xd63   :  { %v1097_v40 = vpop.permute.xlu1 %1096 }
 0xd64   :  { %v1099_v41 = vadd.f32 %v1097_v40, %v1089_v39  ;;  %v2400_v39 = vld [vmem:[%s3149_s4] sm:$0xff]   ;;  %s2684_s4 = smov 32  }
 0xd66   :  { %2469 = vtanh.f32 %v1099_v41 }
 0xd67   :  { %2471 = vpow2.f32 %v2226_v42  ;;  %v1496_v42 = vld [vmem:[#allocation7] sm:$0x3] }
 0xd73   :  { %v2470_v24 = vpop.eup %2469 }
 0xd74   :  { %1102 = vrot.lane.b32.xlu0 %v2470_v24, %s2676_s3  ;;  %v2472_v43 = vpop.eup %2471  ;;  %v2970_v24 = vld [vmem:[#allocation14] sm:$0xff]  }
 0xd75   :  { %v1083_v44 = vadd.f32 1.0, %v2472_v43  ;;  %v1497_v43 = vld [vmem:[#allocation8] sm:$0x3] }
 0xd77   :  { %2473 = vrcp.f32 %v1083_v44  ;;  %v1498_v44 = vpack.c.bf16 %v1496_v42, %v1496_v42 }
 0xd84   :  { %v2474_v45 = vpop.eup %2473 }
 0xde6   :  { %v1103_v46 = vpop.permute.xlu0 %1102 }
 0xde7   :  { %v1105_v47 = vmul.f32 %v2474_v45, %v1103_v46 }
 0xde9   :  { %1107 = vst.msk [vmem:[#allocation3 + $0xa] sm:$0x3] %vm85_vm0, %v1105_v47  ;;  %v1108_v48 = vpack.c.bf16 %v1105_v47, %v1105_v47 }
 0xdeb   :  { %2227 = vmatmul.mubr.msk.bf16.vlgmr.msra.gmra.mxu1 %vm572_vm3, %v1108_v48 }
 0xdec   :  { %2294 = vmatpush3.bf16.msra.mxu1 %v2397_v32  ;;  %2301 = vmatprep.mubr.msk.bf16.mxu1 %vm2683_vm4, %v2681_v4 }
 0xded   :  { %2295 = vmatprep.subr.bf16.mxu1 %v2681_v4 }
 0xdf0   :  { %2296 = vmatpush3.bf16.msra.mxu1 %v2398_v35 }
 0xdf1   :  { %2297 = vmatprep.subr.bf16.mxu1 %v2681_v4 }
 0xdf4   :  { %2298 = vmatpush3.bf16.msra.mxu1 %v2399_v38 }
 0xdf5   :  { %2299 = vmatprep.subr.bf16.mxu1 %v2681_v4 }
 0xdf8   :  { %2300 = vmatpush3.bf16.msra.mxu1 %v2400_v39 }
 0xdf9   :  { %2321 = vmatprep.subr.bf16.mxu1 %v2681_v4 }
 0xeab   :  { %v1160_v52 = vpop.f32.mrf.mxu1 }
 0xeac   :  { %v1161_v59 = vadd.f32 %v1160_v52, %v1119_v51  ;;  %v1299_v51 = vld [vmem:[#allocation3 + $0x6] sm:$0x3]  ;;  %v1297_v52 = vld [vmem:[#allocation3 + $0x2] sm:$0x3] }
 0xead   :  { %v1162_v54 = vpop.f32.mrf.mxu1 }
 0xeae   :  { %v1163_v55 = vadd.f32 %v1162_v54, %v1120_v53  ;;  %v2228_v60 = vmul.f32 -1.442695, %v1161_v59  ;;  %v1298_v53 = vld [vmem:[#allocation3 + $0x4] sm:$0x3]  ;;  %v1301_v54 = vld [vmem:[#allocation3 + $0xa] sm:$0x3] }
 0xeaf   :  { %v1164_v56 = vpop.f32.mrf.mxu1 }
 0xeb0   :  { %2475 = vtanh.f32 %v1163_v55  ;;  %v2229_v10 = vmul.f32 -1.442695, %v1163_v55  ;;  %v1313_v55 = vcombine.low %v1298_v53, %v1299_v51  ;;  %v1296_v56 = vld [vmem:[#allocation3] sm:$0x3] }
 0xeb1   :  { %v1165_v57 = vpop.f32.mrf.mxu1  ;;  %2477 = vpow2.f32 %v2228_v60 }
 0xeb2   :  { %v1300_v57 = vld [vmem:[#allocation3 + $0x8] sm:$0x3] }
 0xeb3   :  { %v1329_v59 = vcombine.low %v1300_v57, %v1301_v54 }
 0xebd   :  { %v2476_v58 = vpop.eup %2475 }
 0xebe   :  { %1182 = vrot.lane.b32.xlu1 %v2476_v58, %s2676_s3  ;;  %v2478_v61 = vpop.eup %2477  ;;  %v1312_v58 = vcombine.low %v1296_v56, %v1297_v52 }
 0xebf   :  { %v1173_v62 = vadd.f32 1.0, %v2478_v61 }
 0xec1   :  { %2479 = vrcp.f32 %v1173_v62  ;;  %v1327_v62 = vrot.slane %v1313_v55, %v2761_v9 }
 0xece   :  { %v2480_v63 = vpop.eup %2479 }
 0xecf   :  { %v1180_v3 = vmul.f32 %v2480_v63, %v1099_v41  ;;  %v2963_v41 = vld [vmem:[#allocation14 + $0x8] sm:$0xff]  }
 0xf30   :  { %v1183_v0 = vpop.permute.xlu1 %1182 }
 0xf31   :  { %v1185_v2 = vmul.f32 %v2480_v63, %v1183_v0  ;;  %v1320_v0 = vrot.slane %v1312_v58, %v2761_v9 }
 0xf33   :  { %1187 = vrot.lane.b32.xlu0 %v1185_v2, %s2676_s3  ;;  %v1337_v2 = vrot.slane %v1329_v59, %v2761_v9 }
 0xfa5   :  { %v1188_v5 = vpop.permute.xlu0 %1187 }
 0xfa6   :  { %v1190_v7 = vadd.f32 %v1188_v5, %v1180_v3  ;;  %v1328_v5 = vcombine.low %v1320_v0, %v1327_v62 }
 0xfa8   :  { %2481 = vtanh.f32 %v1190_v7 }
 0xfa9   :  { %2483 = vpow2.f32 %v2229_v10 }
 0xfb5   :  { %v2482_v8 = vpop.eup %2481 }
 0xfb6   :  { %1193 = vrot.lane.b32.xlu1 %v2482_v8, %s2676_s3  ;;  %v2484_v11 = vpop.eup %2483 }
 0xfb7   :  { %v1174_v12 = vadd.f32 1.0, %v2484_v11 }
 0xfb9   :  { %2485 = vrcp.f32 %v1174_v12 }
 0xfc6   :  { %v2486_v13 = vpop.eup %2485 }
0x1028   :  { %v1194_v14 = vpop.permute.xlu1 %1193 }
0x1029   :  { %v1196_v15 = vmul.f32 %v2486_v13, %v1194_v14  ;;  %v2233_v14 = vld [vmem:[#allocation15] ss:$0 sm:$0xff] }
0x102b   :  { %1198 = vst.msk [vmem:[#allocation3 + $0xc] sm:$0x3] %vm85_vm0, %v1196_v15  ;;  %v1199_v16 = vpack.c.bf16 %v1196_v15, %v1196_v15 }
0x102d   :  { %2230 = vmatmul.mubr.msk.bf16.vlgmr.msra.gmra.mxu0 %vm572_vm3, %v1199_v16 }
0x102e   :  { %2309 = vmatprep.mubr.msk.bf16.mxu0 %vm2683_vm4, %v2681_v4  ;;  %2306 = vmatpush3.bf16.msra.mxu0 %v2963_v41 }
0x102f   :  { %2307 = vmatprep.subr.bf16.mxu0 %v2681_v4 }
0x1032   :  { %2308 = vmatpush3.bf16.msra.mxu0 %v2970_v24  ;;  %v1302_v60 = vld [vmem:[#allocation3 + $0xc] sm:$0x3] }
0x1033   :  { %2313 = vmatprep.subr.bf16.mxu0 %v2681_v4 }
0x1035   :  { %2310 = vmatmul.mubr.msk.bf16.vlgmr.msra.gmra.mxu0 %vm1513_vm6, %v1498_v44 }
0x1036   :  { %2314 = vmatpush3.bf16.msra.mxu0 %v2963_v41  ;;  %2317 = vmatprep.mubr.msk.bf16.mxu0 %vm2683_vm4, %v2681_v4 }
0x1037   :  { %2315 = vmatprep.subr.bf16.mxu0 %v2681_v4 }
0x103a   :  { %2316 = vmatpush3.bf16.msra.mxu0 %v2970_v24 }
0x103b   :  { %2329 = vmatprep.subr.bf16.mxu0 %v2681_v4 }
0x10ed   :  { %v1251_v6 = vpop.f32.mrf.mxu0 }
0x10ee   :  { %v1252_v1 = vadd.f32 %v1251_v6, %v1210_v19 }
0x10ef   :  { %v1253_v21 = vpop.f32.mrf.mxu0 }
0x10f0   :  { %v1254_v22 = vadd.f32 %v1253_v21, %v1211_v20  ;;  %v2231_v27 = vmul.f32 -1.442695, %v1252_v1 }
0x10f1   :  { %v1255_v23 = vpop.f32.mrf.mxu0 }
0x10f2   :  { %2487 = vtanh.f32 %v1254_v22  ;;  %v2232_v45 = vmul.f32 -1.442695, %v1254_v22 }
0x10f3   :  { %v1256_v25 = vpop.f32.mrf.mxu0  ;;  %2489 = vpow2.f32 %v2231_v27 }
0x10f5   :  { %v1551_v10 = vpop.f32.mrf.mxu0 }
0x10f7   :  { %v2311_v11 = vpop.f32.mrf.mxu0 }
0x10f9   :  { %v1554_v12 = vpop.f32.mrf.mxu0 }
0x10fb   :  { %v2312_v13 = vpop.f32.mrf.mxu0 }
0x10ff   :  { %v2488_v26 = vpop.eup %2487 }
0x1100   :  { %1273 = vrot.lane.b32.xlu0 %v2488_v26, %s2676_s3  ;;  %v2490_v28 = vpop.eup %2489 }
0x1101   :  { %v1264_v29 = vadd.f32 1.0, %v2490_v28 }
0x1103   :  { %2491 = vrcp.f32 %v1264_v29 }
0x1110   :  { %v2492_v31 = vpop.eup %2491 }
0x1111   :  { %v1271_v36 = vmul.f32 %v2492_v31, %v1190_v7 }
0x1172   :  { %v1274_v33 = vpop.permute.xlu0 %1273 }
0x1173   :  { %v1276_v34 = vmul.f32 %v2492_v31, %v1274_v33 }
0x1175   :  { %1278 = vrot.lane.b32.xlu1 %v1276_v34, %s2676_s3 }
0x11e7   :  { %v1279_v37 = vpop.permute.xlu1 %1278 }
0x11e8   :  { %v2939_v30 = vadd.f32 %v1279_v37, %v1271_v36 }
0x11ea   :  { %2493 = vtanh.f32 %v2939_v30 }
0x11eb   :  { %2495 = vpow2.f32 %v2232_v45 }
0x11f7   :  { %v2494_v40 = vpop.eup %2493 }
0x11f8   :  { %1284 = vrot.lane.b32.xlu0 %v2494_v40, %s2676_s3  ;;  %v2496_v46 = vpop.eup %2495 }
0x11f9   :  { %v1265_v47 = vadd.f32 1.0, %v2496_v46 }
0x11fb   :  { %2497 = vrcp.f32 %v1265_v47 }
0x11fc   :  { %1565 = vrot.lane.b32.xlu0 %v1497_v43, %s2684_s4 }
0x1208   :  { %v2498_v48 = vpop.eup %2497 }
0x126a   :  { %v1285_v49 = vpop.permute.xlu0 %1284 }
0x126b   :  { %v1287_v50 = vmul.f32 %v2498_v48, %v1285_v49 }
0x126d   :  { %1289 = vst.msk [vmem:[#allocation3 + $0xe] sm:$0x3] %vm85_vm0, %v1287_v50  ;;  %1290 = vst.msk [vmem:[#allocation5] sm:$0x3] %vm85_vm0, %v1287_v50 }
0x126e   :  { %v1566_v49 = vpop.permute.xlu0 %1565 }
0x1274   :  { %v1303_v61 = vld [vmem:[#allocation3 + $0xe] sm:$0x3] }
0x1275   :  { %v1330_v63 = vcombine.low %v1302_v60, %v1303_v61 }
0x1277   :  { %v1344_v3 = vrot.slane %v1330_v63, %v2761_v9 }
0x1279   :  { %v1345_v7 = vcombine.low %v1337_v2, %v1344_v3 }
0x127b   :  { %v1348_v8 = vpack.c.bf16 %v1345_v7, %v1328_v5 }
0x127d   :  { %2302 = vmatmul.mubr.msk.bf16.vlgmr.msra.gmra.mxu1 %vm572_vm3, %v1348_v8 }
0x127e   :  { %2322 = vmatpush3.bf16.msra.mxu1 %v2963_v41  ;;  %2325 = vmatprep.mubr.msk.bf16.mxu1 %vm2683_vm4, %v2681_v4 }
0x127f   :  { %2323 = vmatprep.subr.bf16.mxu1 %v2681_v4 }
0x1282   :  { %2324 = vmatpush3.bf16.msra.mxu1 %v2970_v24 }
0x1283   :  { %2337 = vmatprep.subr.bf16.mxu1 %v2681_v4 }
0x133d   :  { %v1425_v15 = vpop.f32.mrf.mxu1 }
0x133e   :  { %v1426_v16 = vadd.f32 %v2233_v14, %v1425_v15 }
0x133f   :  { %v2303_v17 = vpop.f32.mrf.mxu1 }
0x1340   :  { %v1434_v18 = vcombine.high %v1426_v16, %v1426_v16  ;;  %v1441_v19 = vrot.slane %v1426_v16, %v2761_v9 }
0x1341   :  { %v1428_v6 = vpop.f32.mrf.mxu1 }
0x1342   :  { %v1448_v20 = vrot.slane %v1434_v18, %v2761_v9  ;;  %v1449_v21 = vcombine.high %v1441_v19, %v1441_v19  ;;  %v1476_v22 = vpack.c.bf16 %v1441_v19, %v1441_v19  ;;  %v1429_v23 = vadd.f32 %v2233_v14, %v1428_v6 }
0x1343   :  { %v2304_v25 = vpop.f32.mrf.mxu1 }
0x1344   :  { %v1450_v26 = vcombine.high %v1448_v20, %v1448_v20  ;;  %v1477_v1 = vpack.c.bf16 %v1449_v21, %v1449_v21  ;;  %v1478_v27 = vpack.c.bf16 %v1448_v20, %v1448_v20  ;;  %1484 = vst [vmem:[#allocation4] sm:$0x1] %v1476_v22  ;;  %v1451_v28 = vcombine.high %v1429_v23, %v1429_v23 }
0x1345   :  { %v1458_v29 = vrot.slane %v1429_v23, %v2761_v9 }
0x1346   :  { %v1479_v31 = vpack.c.bf16 %v1450_v26, %v1450_v26  ;;  %1485 = vst [vmem:[#allocation4 + $0x1] sm:$0x1] %v1477_v1  ;;  %1486 = vst [vmem:[#allocation4 + $0x2] sm:$0x1] %v1478_v27  ;;  %v1465_v33 = vrot.slane %v1451_v28, %v2761_v9 }
0x1347   :  { %v1466_v34 = vcombine.high %v1458_v29, %v1458_v29  ;;  %v1480_v36 = vpack.c.bf16 %v1458_v29, %v1458_v29 }
0x1348   :  { %1487 = vst [vmem:[#allocation4 + $0x3] sm:$0x1] %v1479_v31  ;;  %v1467_v37 = vcombine.high %v1465_v33, %v1465_v33  ;;  %v1482_v32 = vpack.c.bf16 %v1465_v33, %v1465_v33 }
0x1349   :  { %v1481_v35 = vpack.c.bf16 %v1466_v34, %v1466_v34  ;;  %1488 = vst [vmem:[#allocation4 + $0x4] sm:$0x1] %v1480_v36 }
0x134a   :  { %v1483_v38 = vpack.c.bf16 %v1467_v37, %v1467_v37  ;;  %1490 = vst [vmem:[#allocation4 + $0x6] sm:$0x1] %v1482_v32 }
0x134b   :  { %1489 = vst [vmem:[#allocation4 + $0x5] sm:$0x1] %v1481_v35  ;;  %v1499_v39 = vld [vmem:[#allocation4] sm:$0x1] }
0x134c   :  { %1491 = vst [vmem:[#allocation4 + $0x7] sm:$0x1] %v1483_v38  ;;  %v1500_v40 = vunpack.c.l.bf16 %v1499_v39 }
0x134d   :  { %v1593_v58 = vld [vmem:[#allocation4 + $0x1] sm:$0x1]  ;;  %v1673_v6 = vld [vmem:[#allocation4 + $0x2] sm:$0x1] }
0x134e   :  { %v1552_v42 = vadd.f32 %v1551_v10, %v1500_v40  ;;  %v1594_v59 = vunpack.c.l.bf16 %v1593_v58  ;;  %v1674_v20 = vunpack.c.l.bf16 %v1673_v6 }
0x1350   :  { %2499 = vtanh.f32 %v1552_v42  ;;  %v2242_v44 = vmul.f32 -1.442695, %v1552_v42 }
0x1352   :  { %2501 = vpow2.f32 %v2242_v44 }
0x135d   :  { %v2500_v43 = vpop.eup %2499 }
0x135e   :  { %1570 = vrot.lane.b32.xlu1 %v2500_v43, %s2684_s4  ;;  %v1753_v43 = vld [vmem:[#allocation4 + $0x3] sm:$0x1] }
0x135f   :  { %v2502_v9 = vpop.eup %2501  ;;  %v1754_v44 = vunpack.c.l.bf16 %v1753_v43 }
0x1360   :  { %v1560_v45 = vadd.f32 1.0, %v2502_v9 }
0x1362   :  { %2503 = vrcp.f32 %v1560_v45 }
0x136f   :  { %v2504_v46 = vpop.eup %2503 }
0x1370   :  { %v1568_v50 = vmul.f32 %v2504_v46, %v1566_v49 }
0x13d0   :  { %v1571_v47 = vpop.permute.xlu1 %1570 }
0x13d1   :  { %v1573_v48 = vmul.f32 %v2504_v46, %v1571_v47 }
0x13d3   :  { %1575 = vrot.lane.b32.xlu1 %v1573_v48, %s2684_s4 }
0x1445   :  { %v1576_v51 = vpop.permute.xlu1 %1575 }
0x1446   :  { %v1578_v52 = vadd.f32 %v1576_v51, %v1568_v50 }
0x1448   :  { %2505 = vtanh.f32 %v1578_v52 }
0x1455   :  { %v2506_v53 = vpop.eup %2505 }
0x1456   :  { %1581 = vrot.lane.b32.xlu0 %v2506_v53, %s2684_s4 }
0x14c8   :  { %v1582_v54 = vpop.permute.xlu0 %1581 }
0x14c9   :  { %v3003_v55 = vmul.f32 %v2504_v46, %v1582_v54 }
0x14cb   :  { %v1591_v56 = vpack.c.bf16 %v3003_v55, %v3003_v55 }
0x14cd   :  { %1596 = vrot.lane.b32.xlu1 %v1591_v56, %s2676_s3 }
0x153f   :  { %v1597_v57 = vpop.permute.xlu1 %1596 }
0x1540   :  { %2318 = vmatmul.mubr.msk.bf16.vlgmr.msra.gmra.mxu0 %vm1513_vm6, %v1597_v57 }
0x1541   :  { %2330 = vmatpush3.bf16.msra.mxu0 %v2963_v41  ;;  %2333 = vmatprep.mubr.msk.bf16.mxu0 %vm2683_vm4, %v2681_v4 }
0x1542   :  { %2331 = vmatprep.subr.bf16.mxu0 %v2681_v4 }
0x1545   :  { %2332 = vmatpush3.bf16.msra.mxu0 %v2970_v24 }
0x1546   :  { %2345 = vmatprep.subr.bf16.mxu0 %v2681_v4 }
0x1600   :  { %v1635_v60 = vpop.f32.mrf.mxu0 }
0x1601   :  { %v1636_v61 = vadd.f32 %v1635_v60, %v1594_v59 }
0x1602   :  { %v2319_v62 = vpop.f32.mrf.mxu0 }
0x1603   :  { %2507 = vtanh.f32 %v1636_v61  ;;  %v2244_v3 = vmul.f32 -1.442695, %v1636_v61 }
0x1604   :  { %v1638_v63 = vpop.f32.mrf.mxu0 }
0x1605   :  { %2509 = vpow2.f32 %v2244_v3 }
0x1606   :  { %v2320_v0 = vpop.f32.mrf.mxu0 }
0x1610   :  { %v2508_v2 = vpop.eup %2507 }
0x1611   :  { %1650 = vrot.lane.b32.xlu0 %v2508_v2, %s2684_s4  ;;  %v1833_v2 = vld [vmem:[#allocation4 + $0x4] sm:$0x1] }
0x1612   :  { %v2510_v5 = vpop.eup %2509  ;;  %v1834_v3 = vunpack.c.l.bf16 %v1833_v2 }
0x1613   :  { %v1644_v7 = vadd.f32 1.0, %v2510_v5 }
0x1615   :  { %2511 = vrcp.f32 %v1644_v7 }
0x1622   :  { %v2512_v8 = vpop.eup %2511 }
0x1623   :  { %v1648_v12 = vmul.f32 %v2512_v8, %v1578_v52 }
0x1683   :  { %v1651_v10 = vpop.permute.xlu0 %1650 }
0x1684   :  { %v1653_v11 = vmul.f32 %v2512_v8, %v1651_v10 }
0x1686   :  { %1655 = vrot.lane.b32.xlu1 %v1653_v11, %s2684_s4 }
0x16f8   :  { %v1656_v13 = vpop.permute.xlu1 %1655 }
0x16f9   :  { %v1658_v14 = vadd.f32 %v1656_v13, %v1648_v12 }
0x16fb   :  { %2513 = vtanh.f32 %v1658_v14 }
0x1708   :  { %v2514_v15 = vpop.eup %2513 }
0x1709   :  { %1661 = vrot.lane.b32.xlu0 %v2514_v15, %s2684_s4 }
0x177b   :  { %v1662_v16 = vpop.permute.xlu0 %1661 }
0x177c   :  { %v3018_v17 = vmul.f32 %v2512_v8, %v1662_v16 }
0x177e   :  { %v1671_v18 = vpack.c.bf16 %v3018_v17, %v3018_v17 }
0x1780   :  { %1676 = vrot.lane.b32.xlu1 %v1671_v18, %s2676_s3 }
0x17f2   :  { %v1677_v19 = vpop.permute.xlu1 %1676 }
0x17f3   :  { %2326 = vmatmul.mubr.msk.bf16.vlgmr.msra.gmra.mxu1 %vm1513_vm6, %v1677_v19 }
0x17f4   :  { %2338 = vmatpush3.bf16.msra.mxu1 %v2963_v41  ;;  %2341 = vmatprep.mubr.msk.bf16.mxu1 %vm2683_vm4, %v2681_v4 }
0x17f5   :  { %2339 = vmatprep.subr.bf16.mxu1 %v2681_v4 }
0x17f8   :  { %2340 = vmatpush3.bf16.msra.mxu1 %v2970_v24 }
0x17f9   :  { %2353 = vmatprep.subr.bf16.mxu1 %v2681_v4 }
0x18b3   :  { %v1715_v21 = vpop.f32.mrf.mxu1 }
0x18b4   :  { %v1716_v22 = vadd.f32 %v1715_v21, %v1674_v20 }
0x18b5   :  { %v2327_v23 = vpop.f32.mrf.mxu1 }
0x18b6   :  { %2515 = vtanh.f32 %v1716_v22  ;;  %v2247_v27 = vmul.f32 -1.442695, %v1716_v22 }
0x18b7   :  { %v1718_v25 = vpop.f32.mrf.mxu1 }
0x18b8   :  { %2517 = vpow2.f32 %v2247_v27  ;;  %v1913_v27 = vld [vmem:[#allocation4 + $0x5] sm:$0x1] }
0x18b9   :  { %v2328_v26 = vpop.f32.mrf.mxu1 }
0x18c3   :  { %v2516_v1 = vpop.eup %2515 }
0x18c4   :  { %1730 = vrot.lane.b32.xlu0 %v2516_v1, %s2684_s4 }
0x18c5   :  { %v2518_v28 = vpop.eup %2517 }
0x18c6   :  { %v1724_v29 = vadd.f32 1.0, %v2518_v28  ;;  %v1914_v28 = vunpack.c.l.bf16 %v1913_v27 }
0x18c8   :  { %2519 = vrcp.f32 %v1724_v29 }
0x18d5   :  { %v2520_v31 = vpop.eup %2519 }
0x18d6   :  { %v1728_v36 = vmul.f32 %v2520_v31, %v1658_v14 }
0x1936   :  { %v1731_v33 = vpop.permute.xlu0 %1730 }
0x1937   :  { %v1733_v34 = vmul.f32 %v2520_v31, %v1731_v33 }
0x1939   :  { %1735 = vrot.lane.b32.xlu1 %v1733_v34, %s2684_s4 }
0x19ab   :  { %v1736_v37 = vpop.permute.xlu1 %1735 }
0x19ac   :  { %v1738_v32 = vadd.f32 %v1736_v37, %v1728_v36 }
0x19ae   :  { %2521 = vtanh.f32 %v1738_v32 }
0x19bb   :  { %v2522_v35 = vpop.eup %2521 }
0x19bc   :  { %1741 = vrot.lane.b32.xlu0 %v2522_v35, %s2684_s4 }
0x1a2e   :  { %v1742_v38 = vpop.permute.xlu0 %1741 }
0x1a2f   :  { %v3033_v39 = vmul.f32 %v2520_v31, %v1742_v38 }
0x1a31   :  { %v1751_v40 = vpack.c.bf16 %v3033_v39, %v3033_v39 }
0x1a33   :  { %1756 = vrot.lane.b32.xlu1 %v1751_v40, %s2676_s3 }
0x1aa5   :  { %v1757_v42 = vpop.permute.xlu1 %1756 }
0x1aa6   :  { %2334 = vmatmul.mubr.msk.bf16.vlgmr.msra.gmra.mxu0 %vm1513_vm6, %v1757_v42 }
0x1aa7   :  { %2346 = vmatpush3.bf16.msra.mxu0 %v2963_v41  ;;  %2349 = vmatprep.mubr.msk.bf16.mxu0 %vm2683_vm4, %v2681_v4 }
0x1aa8   :  { %2347 = vmatprep.subr.bf16.mxu0 %v2681_v4 }
0x1aab   :  { %2348 = vmatpush3.bf16.msra.mxu0 %v2970_v24 }
0x1aac   :  { %2361 = vmatprep.subr.bf16.mxu0 %v2681_v4 }
0x1b66   :  { %v1795_v9 = vpop.f32.mrf.mxu0 }
0x1b67   :  { %v1796_v45 = vadd.f32 %v1795_v9, %v1754_v44 }
0x1b68   :  { %v2335_v46 = vpop.f32.mrf.mxu0 }
0x1b69   :  { %2523 = vtanh.f32 %v1796_v45  ;;  %v2250_v50 = vmul.f32 -1.442695, %v1796_v45 }
0x1b6a   :  { %v1798_v47 = vpop.f32.mrf.mxu0 }
0x1b6b   :  { %2525 = vpow2.f32 %v2250_v50 }
0x1b6c   :  { %v2336_v48 = vpop.f32.mrf.mxu0 }
0x1b6d   :  { %v1993_v48 = vld [vmem:[#allocation4 + $0x6] sm:$0x1] }
0x1b76   :  { %v2524_v49 = vpop.eup %2523 }
0x1b77   :  { %1810 = vrot.lane.b32.xlu0 %v2524_v49, %s2684_s4  ;;  %v1994_v49 = vunpack.c.l.bf16 %v1993_v48 }
0x1b78   :  { %v2526_v51 = vpop.eup %2525 }
0x1b79   :  { %v1804_v52 = vadd.f32 1.0, %v2526_v51 }
0x1b7b   :  { %2527 = vrcp.f32 %v1804_v52 }
0x1b88   :  { %v2528_v53 = vpop.eup %2527 }
0x1b89   :  { %v1808_v57 = vmul.f32 %v2528_v53, %v1738_v32 }
0x1be9   :  { %v1811_v54 = vpop.permute.xlu0 %1810 }
0x1bea   :  { %v1813_v56 = vmul.f32 %v2528_v53, %v1811_v54 }
0x1bec   :  { %1815 = vrot.lane.b32.xlu1 %v1813_v56, %s2684_s4 }
0x1c5e   :  { %v1816_v58 = vpop.permute.xlu1 %1815 }
0x1c5f   :  { %v1818_v59 = vadd.f32 %v1816_v58, %v1808_v57 }
0x1c61   :  { %2529 = vtanh.f32 %v1818_v59 }
0x1c6e   :  { %v2530_v60 = vpop.eup %2529 }
0x1c6f   :  { %1821 = vrot.lane.b32.xlu0 %v2530_v60, %s2684_s4 }
0x1ce1   :  { %v1822_v61 = vpop.permute.xlu0 %1821 }
0x1ce2   :  { %v3048_v62 = vmul.f32 %v2528_v53, %v1822_v61 }
0x1ce4   :  { %v1831_v63 = vpack.c.bf16 %v3048_v62, %v3048_v62 }
0x1ce6   :  { %1836 = vrot.lane.b32.xlu1 %v1831_v63, %s2676_s3 }
0x1d58   :  { %v1837_v0 = vpop.permute.xlu1 %1836 }
0x1d59   :  { %2342 = vmatmul.mubr.msk.bf16.vlgmr.msra.gmra.mxu1 %vm1513_vm6, %v1837_v0 }
0x1d5a   :  { %2354 = vmatpush3.bf16.msra.mxu1 %v2963_v41  ;;  %2357 = vmatprep.mubr.msk.bf16.mxu1 %vm2683_vm4, %v2681_v4 }
0x1d5b   :  { %2355 = vmatprep.subr.bf16.mxu1 %v2681_v4 }
0x1d5e   :  { %2356 = vmatpush3.bf16.msra.mxu1 %v2970_v24 }
0x1e19   :  { %v1875_v5 = vpop.f32.mrf.mxu1 }
0x1e1a   :  { %v1876_v7 = vadd.f32 %v1875_v5, %v1834_v3 }
0x1e1b   :  { %v2343_v8 = vpop.f32.mrf.mxu1 }
0x1e1c   :  { %2531 = vtanh.f32 %v1876_v7  ;;  %v2253_v13 = vmul.f32 -1.442695, %v1876_v7 }
0x1e1d   :  { %v1878_v10 = vpop.f32.mrf.mxu1 }
0x1e1e   :  { %2533 = vpow2.f32 %v2253_v13 }
0x1e1f   :  { %v2344_v11 = vpop.f32.mrf.mxu1 }
0x1e29   :  { %v2532_v12 = vpop.eup %2531 }
0x1e2a   :  { %1890 = vrot.lane.b32.xlu0 %v2532_v12, %s2684_s4  ;;  %v2073_v12 = vld [vmem:[#allocation4 + $0x7] sm:$0x1] }
0x1e2b   :  { %v2534_v14 = vpop.eup %2533  ;;  %v2074_v13 = vunpack.c.l.bf16 %v2073_v12 }
0x1e2c   :  { %v1884_v15 = vadd.f32 1.0, %v2534_v14 }
0x1e2e   :  { %2535 = vrcp.f32 %v1884_v15 }
0x1e3b   :  { %v2536_v16 = vpop.eup %2535 }
0x1e3c   :  { %v1888_v6 = vmul.f32 %v2536_v16, %v1818_v59 }
0x1e9c   :  { %v1891_v18 = vpop.permute.xlu0 %1890 }
0x1e9d   :  { %v1893_v19 = vmul.f32 %v2536_v16, %v1891_v18 }
0x1e9f   :  { %1895 = vrot.lane.b32.xlu1 %v1893_v19, %s2684_s4 }
0x1f11   :  { %v1896_v20 = vpop.permute.xlu1 %1895 }
0x1f12   :  { %v1898_v21 = vadd.f32 %v1896_v20, %v1888_v6 }
0x1f14   :  { %2537 = vtanh.f32 %v1898_v21 }
0x1f21   :  { %v2538_v22 = vpop.eup %2537 }
0x1f22   :  { %1901 = vrot.lane.b32.xlu0 %v2538_v22, %s2684_s4 }
0x1f94   :  { %v1902_v23 = vpop.permute.xlu0 %1901 }
0x1f95   :  { %v3062_v25 = vmul.f32 %v2536_v16, %v1902_v23 }
0x1f97   :  { %v1911_v26 = vpack.c.bf16 %v3062_v25, %v3062_v25 }
0x1f99   :  { %1916 = vrot.lane.b32.xlu1 %v1911_v26, %s2676_s3 }
0x200b   :  { %v1917_v1 = vpop.permute.xlu1 %1916 }
0x200c   :  { %2350 = vmatmul.mubr.msk.bf16.vlgmr.msra.gmra.mxu0 %vm1513_vm6, %v1917_v1 }
0x200d   :  { %2362 = vmatpush3.bf16.msra.mxu0 %v2963_v41  ;;  %2365 = vmatprep.mubr.msk.bf16.mxu0 %vm2683_vm4, %v2681_v4 }
0x200e   :  { %2363 = vmatprep.subr.bf16.mxu0 %v2681_v4 }
0x2011   :  { %2364 = vmatpush3.bf16.msra.mxu0 %v2970_v24 }
0x20cc   :  { %v1955_v29 = vpop.f32.mrf.mxu0 }
0x20cd   :  { %v1956_v31 = vadd.f32 %v1955_v29, %v1914_v28 }
0x20ce   :  { %v2351_v33 = vpop.f32.mrf.mxu0 }
0x20cf   :  { %2539 = vtanh.f32 %v1956_v31  ;;  %v2256_v32 = vmul.f32 -1.442695, %v1956_v31 }
0x20d0   :  { %v1958_v34 = vpop.f32.mrf.mxu0 }
0x20d1   :  { %2541 = vpow2.f32 %v2256_v32 }
0x20d2   :  { %v2352_v36 = vpop.f32.mrf.mxu0 }
0x20dc   :  { %v2540_v37 = vpop.eup %2539 }
0x20dd   :  { %1970 = vrot.lane.b32.xlu0 %v2540_v37, %s2684_s4 }
0x20de   :  { %v2542_v41 = vpop.eup %2541 }
0x20df   :  { %v1964_v35 = vadd.f32 1.0, %v2542_v41 }
0x20e1   :  { %2543 = vrcp.f32 %v1964_v35 }
0x20ee   :  { %v2544_v38 = vpop.eup %2543 }
0x20ef   :  { %v1968_v24 = vmul.f32 %v2544_v38, %v1898_v21 }
0x214f   :  { %v1971_v4 = vpop.permute.xlu0 %1970 }
0x2150   :  { %v1973_v40 = vmul.f32 %v2544_v38, %v1971_v4 }
0x2152   :  { %1975 = vrot.lane.b32.xlu1 %v1973_v40, %s2684_s4 }
0x21c4   :  { %v1976_v42 = vpop.permute.xlu1 %1975 }
0x21c5   :  { %v1978_v43 = vadd.f32 %v1976_v42, %v1968_v24 }
0x21c7   :  { %2545 = vtanh.f32 %v1978_v43 }
0x21d4   :  { %v2546_v44 = vpop.eup %2545 }
0x21d5   :  { %1981 = vrot.lane.b32.xlu0 %v2546_v44, %s2684_s4 }
0x2247   :  { %v1982_v9 = vpop.permute.xlu0 %1981 }
0x2248   :  { %v3076_v45 = vmul.f32 %v2544_v38, %v1982_v9 }
0x224a   :  { %v1991_v46 = vpack.c.bf16 %v3076_v45, %v3076_v45 }
0x224c   :  { %1996 = vrot.lane.b32.xlu1 %v1991_v46, %s2676_s3 }
0x22be   :  { %v1997_v47 = vpop.permute.xlu1 %1996 }
0x22bf   :  { %2358 = vmatmul.mubr.msk.bf16.vlgmr.msra.gmra.mxu1 %vm1513_vm6, %v1997_v47 }
0x237f   :  { %v2035_v50 = vpop.f32.mrf.mxu1 }
0x2380   :  { %v2036_v51 = vadd.f32 %v2035_v50, %v1994_v49 }
0x2381   :  { %v2359_v52 = vpop.f32.mrf.mxu1 }
0x2382   :  { %2547 = vtanh.f32 %v2036_v51  ;;  %v2259_v57 = vmul.f32 -1.442695, %v2036_v51 }
0x2383   :  { %v2038_v53 = vpop.f32.mrf.mxu1 }
0x2384   :  { %2549 = vpow2.f32 %v2259_v57 }
0x2385   :  { %v2360_v54 = vpop.f32.mrf.mxu1 }
0x238f   :  { %v2548_v56 = vpop.eup %2547 }
0x2390   :  { %2050 = vrot.lane.b32.xlu0 %v2548_v56, %s2684_s4 }
0x2391   :  { %v2550_v58 = vpop.eup %2549 }
0x2392   :  { %v2044_v59 = vadd.f32 1.0, %v2550_v58 }
0x2394   :  { %2551 = vrcp.f32 %v2044_v59 }
0x23a1   :  { %v2552_v60 = vpop.eup %2551 }
0x23a2   :  { %v2048_v0 = vmul.f32 %v2552_v60, %v1978_v43 }
0x2402   :  { %v2051_v61 = vpop.permute.xlu0 %2050 }
0x2403   :  { %v2053_v63 = vmul.f32 %v2552_v60, %v2051_v61 }
0x2405   :  { %2055 = vrot.lane.b32.xlu1 %v2053_v63, %s2684_s4 }
0x2477   :  { %v2056_v2 = vpop.permute.xlu1 %2055 }
0x2478   :  { %v2058_v3 = vadd.f32 %v2056_v2, %v2048_v0 }
0x247a   :  { %2553 = vtanh.f32 %v2058_v3 }
0x2487   :  { %v2554_v5 = vpop.eup %2553 }
0x2488   :  { %2061 = vrot.lane.b32.xlu0 %v2554_v5, %s2684_s4 }
0x24fa   :  { %v2062_v7 = vpop.permute.xlu0 %2061 }
0x24fb   :  { %v2064_v8 = vmul.f32 %v2552_v60, %v2062_v7 }
0x24fd   :  { %v2071_v10 = vpack.c.bf16 %v2064_v8, %v2064_v8 }
0x24ff   :  { %2076 = vrot.lane.b32.xlu1 %v2071_v10, %s2676_s3 }
0x2571   :  { %v2077_v11 = vpop.permute.xlu1 %2076 }
0x2572   :  { %2366 = vmatmul.mubr.msk.bf16.vlgmr.msra.gmra.mxu0 %vm1513_vm6, %v2077_v11 }
0x2632   :  { %v2115_v14 = vpop.f32.mrf.mxu0 }
0x2633   :  { %v2116_v15 = vadd.f32 %v2115_v14, %v2074_v13 }
0x2634   :  { %v2367_v16 = vpop.f32.mrf.mxu0 }
0x2635   :  { %2555 = vtanh.f32 %v2116_v15  ;;  %v2262_v20 = vmul.f32 -1.442695, %v2116_v15 }
0x2636   :  { %v2118_v18 = vpop.f32.mrf.mxu0 }
0x2637   :  { %2557 = vpow2.f32 %v2262_v20 }
0x2638   :  { %v2368_v19 = vpop.f32.mrf.mxu0 }
0x2642   :  { %v2556_v6 = vpop.eup %2555 }
0x2643   :  { %2130 = vrot.lane.b32.xlu0 %v2556_v6, %s2684_s4 }
0x2644   :  { %v2558_v21 = vpop.eup %2557 }
0x2645   :  { %v2124_v22 = vadd.f32 1.0, %v2558_v21 }
0x2647   :  { %2559 = vrcp.f32 %v2124_v22 }
0x2654   :  { %v2560_v23 = vpop.eup %2559 }
0x2655   :  { %v2128_v27 = vmul.f32 %v2560_v23, %v2058_v3 }
0x26b5   :  { %v2131_v26 = vpop.permute.xlu0 %2130 }
0x26b6   :  { %v2133_v1 = vmul.f32 %v2560_v23, %v2131_v26 }
0x26b8   :  { %2135 = vrot.lane.b32.xlu1 %v2133_v1, %s2684_s4 }
0x26bc   :  { %1586 = vrot.lane.b32.xlu1 %v3003_v55, %s2676_s3 }
0x26c0   :  { %1746 = vrot.lane.b32.xlu1 %v3033_v39, %s2676_s3 }
0x26c4   :  { %1906 = vrot.lane.b32.xlu1 %v3062_v25, %s2676_s3 }
0x272a   :  { %v2136_v28 = vpop.permute.xlu1 %2135 }
0x272b   :  { %v2138_v29 = vadd.f32 %v2136_v28, %v2128_v27 }
0x272d   :  { %2561 = vtanh.f32 %v2138_v29 }
0x272e   :  { %v1587_v31 = vpop.permute.xlu1 %1586 }
0x272f   :  { %1590 = vst.msk [vmem:[%s3152_s7] sm:$0x3] %vm88_vm5, %v1587_v31 }
0x2732   :  { %v1747_v33 = vpop.permute.xlu1 %1746 }
0x2733   :  { %2248 = vst.msk [vmem:[%s3152_s7 + $0x4] sm:$0x3] %vm88_vm5, %v1747_v33 }
0x2736   :  { %v1907_v55 = vpop.permute.xlu1 %1906 }
0x2737   :  { %2254 = vst.msk [vmem:[%s3152_s7 + $0x8] sm:$0x3] %vm88_vm5, %v1907_v55 }
0x273a   :  { %v2562_v39 = vpop.eup %2561 }
0x273b   :  { %2141 = vrot.lane.b32.xlu0 %v2562_v39, %s2684_s4 }
0x273f   :  { %1292 = vrot.lane.b32.xlu0 %v2939_v30, %s2676_s3 }
0x2743   :  { %1666 = vrot.lane.b32.xlu0 %v3018_v17, %s2676_s3 }
0x2747   :  { %1826 = vrot.lane.b32.xlu0 %v3048_v62, %s2676_s3 }
0x274b   :  { %1986 = vrot.lane.b32.xlu0 %v3076_v45, %s2676_s3 }
0x274f   :  { %2153 = vrot.lane.b32.xlu0 %v2138_v29, %s2685_s9 }
0x27ad   :  { %v2142_v25 = vpop.permute.xlu0 %2141 }
0x27ae   :  { %v2144_v34 = vmul.f32 %v2560_v23, %v2142_v25 }
0x27b0   :  { %2146 = vrot.lane.b32.xlu1 %v2144_v34, %s2676_s3 }
0x27b1   :  { %v1293_v36 = vpop.permute.xlu0 %1292 }
0x27b2   :  { %1295 = vst.msk [vmem:[#allocation6] sm:$0x3] %vm85_vm0, %v1293_v36 }
0x27b4   :  { %2066 = vrot.lane.b32.xlu1 %v2064_v8, %s2676_s3  ;;  %s2686_s3 = smov [#allocation17]  }
0x27b5   :  { %v1667_v30 = vpop.permute.xlu0 %1666  ;;  %s2169_s15 = sshll.u32 %s2686_s3, 4  ;;  %s2170_s15 = int_to_ptr.vmem [resolvable:$true] %s2169_s15 }
0x27b6   :  { %2245 = vst.msk [vmem:[%s3152_s7 + $0x2] sm:$0x3] %vm88_vm5, %v1667_v30  ;;  %s2643_s18 = scalar_lea.vmem %s2170_s15, 32  ;;  %p2648_p7 = scmp.lt.s32.totalorder %s2170_s15, %s2170_s15 }
0x27b7   :  { %p2644_p6 = scmp.ne.s32.totalorder %s2170_s15, %s2643_s18  ;;  %p2649_p8 = scmp.lt.s32.totalorder %s2643_s18, %s2643_s18 }
0x27b9   :  { %v1827_v17 = vpop.permute.xlu0 %1826  ;;  %p2650_p9 = por %p2649_p8, %p2648_p7 }
0x27ba   :  { %2251 = vst.msk [vmem:[%s3152_s7 + $0x6] sm:$0x3] %vm88_vm5, %v1827_v17 }
0x27bb   :  { %p2651_p10 = pnand %p2650_p9, %p2644_p6 }
0x27bd   :  { %v1987_v62 = vpop.permute.xlu0 %1986 }
0x27be   :  { %2257 = vst.msk [vmem:[%s3152_s7 + $0xa] sm:$0x3] %vm88_vm5, %v1987_v62 }
0x27c1   :  { %v2154_v37 = vpop.permute.xlu0 %2153 }
0x27c2   :  { %2156 = vst.msk [vmem:[#allocation8] sm:$0x3] %vm88_vm5, %v2154_v37 }
0x2822   :  { %v2147_v32 = vpop.permute.xlu1 %2146 }
0x2823   :  { %2263 = vst.msk [vmem:[%s3152_s7 + $0xe] sm:$0x3] %vm88_vm5, %v2147_v32  ;;  %2151 = vst.msk [vmem:[#allocation7] sm:$0x3] %vm88_vm5, %v2147_v32 }
0x2824   :  { %2160 = vst.msk [vmem:[#allocation17] sm:$0x3] %vm88_vm5, %v2147_v32 }
0x2825   :  { %2654 = shalt.err (!%p2651_p10)
}
0x2826   :  { %2172 = dma.vmem_to_hbm [thread:$0]  %s2170_s15, 32, %s3153_s8, [#allocation11]   ;;  %v2067_v41 = vpop.permute.xlu1 %2066 }
0x2827   :  { %2260 = vst.msk [vmem:[%s3152_s7 + $0xc] sm:$0x3] %vm88_vm5, %v2067_v41 }
0x2828   :  { %2669 = dma.done.wait [#allocation11], 32  }
0x2829   :  { %2670 = vsyncadd [#allocation11], 4294967264 }
0x282a   :  { %2178 = vsyncpa [#allocation10], 1 }
0x282b   :  { %2179 = vsyncpa [#allocation13], 1 }
0x282c   :  { %2180 = vsyncpa [#allocation16], 1 }
0x282d   :  { %2181 = vsyncpa [#allocation11], 1 }

</bundles_post_ra>
